<compile_context>
chip_gen: v7x
topology: tpu7x:2x2x1
jax: 0.10.0
libtpu: 0.0.40
codegen_flags: <defaults>
</compile_context>

<pallas_src>
import jax
import jax.numpy as jnp
from jax.experimental import pallas as pl
from jax.experimental.pallas import tpu as pltpu


def _vmem_capacity_bytes():
    try:
        return int(pltpu.get_tpu_info().vmem_capacity_bytes)
    except Exception:
        return 64 * 1024 * 1024   # conservative default (v7x)


# ----------------------------------------------------------------------------
# Fused kernel: GRU step (o-tile 0 only) + h2o projection (every o tile).
# ----------------------------------------------------------------------------
def gru4rec_fused_kernel(idx_ref, valid_ref, h0_ref, w_hh_ref, b_ih_ref,
                         b_hh_ref, w_ih_hbm, w_h2o_ref, b_h2o_ref,
                         logit_ref, h_out_ref,
                         gx_ref, h_scr, sem):
    B, Hp3 = gx_ref.shape
    Hp = Hp3 // 3
    C = w_ih_hbm.shape[0]

    @pl.when(pl.program_id(0) == 0)
    def _gru_step():
        # ---- row gather: DMA the B selected rows of w_ih^T from HBM --------
        # All copies signal one shared DMA semaphore.
        for b in range(B):
            i = jnp.clip(idx_ref[b], 0, C - 1)   # clamp -> safe DMA address
            pltpu.make_async_copy(w_ih_hbm.at[pl.ds(i, 1), :],
                                  gx_ref.at[pl.ds(b, 1), :],
                                  sem).start()

        # ---- recurrent matmul overlaps with the in-flight gather DMAs ------
        h0 = h0_ref[...]                                               # (B, Hp)
        gh = jnp.dot(h0, w_hh_ref[...],
                     preferred_element_type=jnp.float32) + b_hh_ref[...]

        # Single aggregated wait: DMA semaphores count bytes, and the B row
        # copies together cover exactly the bytes of gx_ref.
        pltpu.make_async_copy(gx_ref, gx_ref, sem).wait()

        # one_hot semantics for out-of-range indices: gathered row is zeroed.
        gx = gx_ref[...] * valid_ref[...] + b_ih_ref[...]              # (B, 3Hp)

        # PyTorch gate order (r, z, n); Hp % 128 == 0 so every gate slice is
        # 128-lane aligned.  Padded lanes come out exactly 0.
        r = jax.nn.sigmoid(gx[:, :Hp] + gh[:, :Hp])
        z = jax.nn.sigmoid(gx[:, Hp:2 * Hp] + gh[:, Hp:2 * Hp])
        n = jnp.tanh(gx[:, 2 * Hp:] + r * gh[:, 2 * Hp:])
        h_new = (1.0 - z) * n + z * h0                                 # (B, Hp)

        h_out_ref[...] = h_new
        h_scr[...] = h_new.astype(h_scr.dtype)   # cast once for all o tiles

    # ---- h2o projection for this o tile (lane-dense, f32 accumulation) -----
    acc = jnp.dot(h_scr[...], w_h2o_ref[...],
                  preferred_element_type=jnp.float32)
    logit_ref[...] = jnp.tanh(acc + b_h2o_ref[...]).astype(logit_ref.dtype)


# ----------------------------------------------------------------------------
# One-time weight preparation (transpose, per-gate split, lane padding).
# ----------------------------------------------------------------------------
def prepare_gru4rec_params(params, hidden_size, *, o_tile_max=None,
                           h2o_weight_dtype=jnp.bfloat16):
    H = hidden_size
    Hp = ((H + 127) // 128) * 128                    # lane-pad hidden to 128
    C = params["w_ih"].shape[1]
    O = params["w_h2o"].shape[0]
    w_itemsize = jnp.dtype(h2o_weight_dtype).itemsize

    def pack_gates(w, rows):
        # w: (3H, in_dim) PyTorch layout -> (rows, 3*Hp), transposed and
        # zero-padded per gate so each gate occupies its own 128-lane slab.
        in_dim = w.shape[1]
        out = jnp.zeros((rows, 3 * Hp), jnp.float32)
        for g in range(3):
            out = out.at[:in_dim, g * Hp:g * Hp + H].set(
                w[g * H:(g + 1) * H, :].T.astype(jnp.float32))
        return out

    def pack_bias(b):
        out = jnp.zeros((1, 3 * Hp), jnp.float32)
        for g in range(3):
            out = out.at[0, g * Hp:g * Hp + H].set(
                b[g * H:(g + 1) * H].astype(jnp.float32))
        return out

    w_ih_t = pack_gates(params["w_ih"], C)           # (C, 3Hp), stays in HBM
    w_hh_t = pack_gates(params["w_hh"], Hp)          # (Hp, 3Hp), zero rows >= H
    b_ih = pack_bias(params["b_ih"])                 # (1, 3Hp)
    b_hh = pack_bias(params["b_hh"])                 # (1, 3Hp)

    if o_tile_max is None:
        # Generation-aware: keep the double-buffered w_h2o tile at ~1/3 of
        # physical VMEM (64 MiB on v7x, 128 MiB on v5e/v6e).
        budget = _vmem_capacity_bytes() // 3
        o_tile_max = max(128, min(8192,
                                  (budget // (2 * Hp * w_itemsize)) // 128 * 128))

    o_tile = min(int(o_tile_max), ((O + 127) // 128) * 128)
    o_tile = max(128, (o_tile // 128) * 128)         # lane-dense multiple of 128
    o_pad = ((O + o_tile - 1) // o_tile) * o_tile

    w_h2o_t = jnp.zeros((Hp, o_pad), jnp.float32)
    w_h2o_t = w_h2o_t.at[:H, :O].set(params["w_h2o"].T.astype(jnp.float32))
    w_h2o_t = w_h2o_t.astype(h2o_weight_dtype)       # bf16 streaming by default
    b_h2o = jnp.zeros((1, o_pad), jnp.float32).at[0, :O].set(
        params["b_h2o"].astype(jnp.float32))

    return dict(w_ih_t=w_ih_t, w_hh_t=w_hh_t, b_ih=b_ih, b_hh=b_hh,
                w_h2o_t=w_h2o_t, b_h2o=b_h2o,
                H=H, Hp=Hp, C=C, O=O, o_pad=o_pad, o_tile=o_tile)


def _vmem_limit_bytes(B, Hp, o_tile, w_itemsize, h_itemsize, logit_itemsize):
    """Exact VMEM footprint of the fused kernel + ~25% headroom, clamped."""
    Bp = ((B + 7) // 8) * 8
    resident = (
        2 * Bp * Hp * 4              # h0 block (worst-case double buffered)
        + 2 * Bp * 128 * 4           # valid block (lane padded)
        + 2 * Hp * 3 * Hp * 4        # w_hh^T block
        + 2 * 2 * 8 * 3 * Hp * 4     # b_ih / b_hh blocks (sublane padded)
        + Bp * 3 * Hp * 4            # gx scratch
        + Bp * Hp * h_itemsize       # h scratch
        + Bp * Hp * 4                # h_out output block
    )
    per_tile = (Hp * o_tile * w_itemsize     # w_h2o tile
                + 8 * o_tile * 4             # b_h2o tile (sublane padded)
                + Bp * o_tile * logit_itemsize)
    needed = resident + 2 * per_tile         # x2: double-buffered pipeline
    limit = int(needed * 1.25) + (2 << 20)
    cap = _vmem_capacity_bytes()
    return max(16 * 1024 * 1024, min(limit, cap - 4 * 1024 * 1024))


# ----------------------------------------------------------------------------
# Forward wrapper: item_idx (B,) int, hidden (1, B, H) -> (logit (B,O), hidden)
# ----------------------------------------------------------------------------
def gru4rec_forward(item_idx, hidden, prep):
    B = item_idx.shape[0]
    H, Hp, C = prep["H"], prep["Hp"], prep["C"]
    O, o_pad, o_tile = prep["O"], prep["o_pad"], prep["o_tile"]
    n_tiles = o_pad // o_tile
    h2o_dtype = prep["w_h2o_t"].dtype

    idx = item_idx.astype(jnp.int32)                                    # (B,)
    valid = ((idx >= 0) & (idx < C)).astype(jnp.float32)[:, None]       # (B,1)
    h0 = jnp.pad(hidden[0].astype(jnp.float32), ((0, 0), (0, Hp - H)))  # (B,Hp)

    vmem_limit = _vmem_limit_bytes(B, Hp, o_tile,
                                   jnp.dtype(h2o_dtype).itemsize,
                                   jnp.dtype(h2o_dtype).itemsize, 4)

    grid_spec = pltpu.PrefetchScalarGridSpec(
        num_scalar_prefetch=1,                # item indices -> SMEM
        grid=(n_tiles,),
        in_specs=[
            pl.BlockSpec((B, 1), lambda o, _idx: (0, 0)),         # valid
            pl.BlockSpec((B, Hp), lambda o, _idx: (0, 0)),        # h0
            pl.BlockSpec((Hp, 3 * Hp), lambda o, _idx: (0, 0)),   # w_hh^T
            pl.BlockSpec((1, 3 * Hp), lambda o, _idx: (0, 0)),    # b_ih
            pl.BlockSpec((1, 3 * Hp), lambda o, _idx: (0, 0)),    # b_hh
            pl.BlockSpec(memory_space=pl.ANY),                    # w_ih^T (HBM)
            pl.BlockSpec((Hp, o_tile), lambda o, _idx: (0, o)),   # w_h2o^T tile
            pl.BlockSpec((1, o_tile), lambda o, _idx: (0, o)),    # b_h2o tile
        ],
        out_specs=[
            pl.BlockSpec((B, o_tile), lambda o, _idx: (0, o)),    # logits tile
            pl.BlockSpec((B, Hp), lambda o, _idx: (0, 0)),        # h_new
        ],
        scratch_shapes=[
            pltpu.VMEM((B, 3 * Hp), jnp.float32),   # gathered gx rows
            pltpu.VMEM((B, Hp), h2o_dtype),         # h_new, pre-cast once
            pltpu.SemaphoreType.DMA(()),            # shared gather semaphore
        ],
    )

    logit_pad, h_new_pad = pl.pallas_call(
        gru4rec_fused_kernel,
        grid_spec=grid_spec,
        out_shape=(jax.ShapeDtypeStruct((B, o_pad), jnp.float32),
                   jax.ShapeDtypeStruct((B, Hp), jnp.float32)),
        compiler_params=pltpu.CompilerParams(
            # o tiles must run in order on one core: tile 0 produces h_scr.
            dimension_semantics=("arbitrary",),
            vmem_limit_bytes=vmem_limit),
    )(idx, valid, h0, prep["w_hh_t"], prep["b_ih"], prep["b_hh"],
      prep["w_ih_t"], prep["w_h2o_t"], prep["b_h2o"])

    return logit_pad[:, :O], h_new_pad[None, :, :H]


# ----------------------------------------------------------------------------
# Pure-JAX reference mirroring torch.nn.GRU (r,z,n gate order) + Linear + Tanh.
# one_hot(idx) @ W_ih^T is mathematically a row gather (zero row if idx OOB).
# ----------------------------------------------------------------------------
def _reference_forward(item_idx, hidden, params):
    C = params["w_ih"].shape[1]
    H = hidden.shape[-1]
    idx = item_idx.astype(jnp.int32)
    valid = ((idx >= 0) & (idx < C)).astype(jnp.float32)[:, None]
    gx = params["w_ih"].T[jnp.clip(idx, 0, C - 1)] * valid + params["b_ih"]
    h0 = hidden[0]
    gh = h0 @ params["w_hh"].T + params["b_hh"]
    r = jax.nn.sigmoid(gx[:, :H] + gh[:, :H])
    z = jax.nn.sigmoid(gx[:, H:2 * H] + gh[:, H:2 * H])
    n = jnp.tanh(gx[:, 2 * H:] + r * gh[:, 2 * H:])
    h_new = (1.0 - z) * n + z * h0
    logit = jnp.tanh(h_new @ params["w_h2o"].T + params["b_h2o"])
    return logit, h_new[None]


if __name__ == "__main__":
    # Small shapes consistent with the module's forward (single session step).
    B = 8                  # session-parallel mini-batch (production: >= 128)
    input_size = 384       # number of items (== output_size, as GRU4REC assumes)
    output_size = 384
    hidden_size = 32
    num_layers = 1

    key = jax.random.PRNGKey(0)
    ks = jax.random.split(key, 8)
    k_gru = 1.0 / jnp.sqrt(hidden_size)    # PyTorch default GRU/Linear init scale

    params = {
        "w_ih": jax.random.uniform(ks[0], (3 * hidden_size, input_size),
                                   jnp.float32, -k_gru, k_gru),
        "w_hh": jax.random.uniform(ks[1], (3 * hidden_size, hidden_size),
                                   jnp.float32, -k_gru, k_gru),
        "b_ih": jax.random.uniform(ks[2], (3 * hidden_size,),
                                   jnp.float32, -k_gru, k_gru),
        "b_hh": jax.random.uniform(ks[3], (3 * hidden_size,),
                                   jnp.float32, -k_gru, k_gru),
        "w_h2o": jax.random.uniform(ks[4], (output_size, hidden_size),
                                    jnp.float32, -k_gru, k_gru),
        "b_h2o": jax.random.uniform(ks[5], (output_size,),
                                    jnp.float32, -k_gru, k_gru),
    }

    item_idx1 = jax.random.randint(ks[6], (B,), 0, input_size, dtype=jnp.int32)
    item_idx2 = jax.random.randint(ks[7], (B,), 0, input_size, dtype=jnp.int32)
    hidden0 = jnp.zeros((num_layers, B, hidden_size), jnp.float32)  # init_hidden()

    ref_logit1, ref_h1 = _reference_forward(item_idx1, hidden0, params)
    ref_logit2, ref_h2 = _reference_forward(item_idx2, ref_h1, params)

    # ---- exact f32 path; o_tile_max=128 forces a multi-tile fused grid -----
    prep_f32 = prepare_gru4rec_params(params, hidden_size, o_tile_max=128,
                                      h2o_weight_dtype=jnp.float32)
    logit1, h1 = gru4rec_forward(item_idx1, hidden0, prep_f32)
    logit2, h2 = gru4rec_forward(item_idx2, h1, prep_f32)
    jax.block_until_ready((logit1, h1, logit2, h2))

    assert jnp.allclose(logit1, ref_logit1, atol=1e-5, rtol=1e-5)
    assert jnp.allclose(h1[0], ref_h1[0], atol=1e-5, rtol=1e-5)
    assert jnp.allclose(logit2, ref_logit2, atol=1e-4, rtol=1e-4)
    assert jnp.allclose(h2[0], ref_h2[0], atol=1e-4, rtol=1e-4)

    # ---- default path: bf16 weight streaming, multi-tile grid --------------
    prep_bf16 = prepare_gru4rec_params(params, hidden_size, o_tile_max=128)
    logit_b, h_b = gru4rec_forward(item_idx1, hidden0, prep_bf16)
    jax.block_until_ready((logit_b, h_b))
    assert jnp.allclose(h_b[0], ref_h1[0], atol=1e-5, rtol=1e-5)
    assert jnp.allclose(logit_b, ref_logit1, atol=5e-2, rtol=5e-2)

    # ---- default path with generation-aware auto tile (single tile here) ---
    prep_auto = prepare_gru4rec_params(params, hidden_size)
    logit_a, h_a = gru4rec_forward(item_idx1, hidden0, prep_auto)
    jax.block_until_ready((logit_a, h_a))
    assert jnp.allclose(h_a[0], ref_h1[0], atol=1e-5, rtol=1e-5)
    assert jnp.allclose(logit_a, ref_logit1, atol=5e-2, rtol=5e-2)

    print("KERNEL_OK")
</pallas_src>

<mosaic_0001>
module attributes {stable_mosaic.version = 11 : i64} {
  func.func @gru4rec_fused_kernel(%arg0: i32, %arg1: memref<8xi32, #tpu.memory_space<smem>>, %arg2: memref<8x1xf32, #tpu.memory_space<vmem>>, %arg3: memref<8x128xf32, #tpu.memory_space<vmem>>, %arg4: memref<128x384xf32, #tpu.memory_space<vmem>>, %arg5: memref<1x384xf32, #tpu.memory_space<vmem>>, %arg6: memref<1x384xf32, #tpu.memory_space<vmem>>, %arg7: memref<384x384xf32, #tpu.memory_space<any>>, %arg8: memref<128x128xf32, #tpu.memory_space<vmem>>, %arg9: memref<1x128xf32, #tpu.memory_space<vmem>>, %arg10: memref<8x128xf32, #tpu.memory_space<vmem>>, %arg11: memref<8x128xf32, #tpu.memory_space<vmem>>, %arg12: memref<8x384xf32, #tpu.memory_space<vmem>>, %arg13: memref<8x128xf32, #tpu.memory_space<vmem>>, %arg14: memref<!tpu.dma_semaphore, #tpu.memory_space<semaphore_mem>>) attributes {dimension_semantics = [#tpu.dimension_semantics<arbitrary>], iteration_bounds = array<i64: 3>, scalar_prefetch = 1 : i64, scratch_operands = 3 : i64, tpu.core_type = #tpu.core_type<tc>, window_params = [{pipeline_mode = #tpu.pipeline_mode<synchronous>, transform_indices = @transform_0, window_bounds = array<i64: 8, 1>}, {pipeline_mode = #tpu.pipeline_mode<synchronous>, transform_indices = @transform_1, window_bounds = array<i64: 8, 128>}, {pipeline_mode = #tpu.pipeline_mode<synchronous>, transform_indices = @transform_2, window_bounds = array<i64: 128, 384>}, {pipeline_mode = #tpu.pipeline_mode<synchronous>, transform_indices = @transform_3, window_bounds = array<i64: 1, 384>}, {pipeline_mode = #tpu.pipeline_mode<synchronous>, transform_indices = @transform_4, window_bounds = array<i64: 1, 384>}, {}, {transform_indices = @transform_6, window_bounds = array<i64: 128, 128>}, {transform_indices = @transform_7, window_bounds = array<i64: 1, 128>}, {transform_indices = @transform_8, window_bounds = array<i64: 8, 128>}, {pipeline_mode = #tpu.pipeline_mode<synchronous>, transform_indices = @transform_9, window_bounds = array<i64: 8, 128>}]} {
    %c0_i32 = arith.constant 0 : i32
    %0 = arith.cmpi eq, %arg0, %c0_i32 : i32
    %1 = arith.extui %0 : i1 to i32
    %c0_i32_0 = arith.constant 0 : i32
    %2 = arith.cmpi ne, %1, %c0_i32_0 : i32
    scf.if %2 {
      %c0_8 = arith.constant 0 : index
      %11 = memref.load %arg1[%c0_8] : memref<8xi32, #tpu.memory_space<smem>>
      %c0_i32_9 = arith.constant 0 : i32
      %c383_i32 = arith.constant 383 : i32
      %12 = arith.maxsi %c0_i32_9, %11 : i32
      %13 = arith.minsi %c383_i32, %12 : i32
      %c0_i32_10 = arith.constant 0 : i32
      %14 = tpu.memref_slice %arg7[%13, %c0_i32_10] : memref<384x384xf32, #tpu.memory_space<any>> -> memref<1x384xf32, #tpu.memory_space<any>>
      %c0_i32_11 = arith.constant 0 : i32
      %c0_i32_12 = arith.constant 0 : i32
      %15 = tpu.memref_slice %arg12[%c0_i32_11, %c0_i32_12] : memref<8x384xf32, #tpu.memory_space<vmem>> -> memref<1x384xf32, #tpu.memory_space<vmem>>
      tpu.enqueue_dma source(%14 : memref<1x384xf32, #tpu.memory_space<any>>) target(%15 : memref<1x384xf32, #tpu.memory_space<vmem>>) target_semaphore(%arg14 : memref<!tpu.dma_semaphore, #tpu.memory_space<semaphore_mem>>)
      %c1 = arith.constant 1 : index
      %16 = memref.load %arg1[%c1] : memref<8xi32, #tpu.memory_space<smem>>
      %c0_i32_13 = arith.constant 0 : i32
      %c383_i32_14 = arith.constant 383 : i32
      %17 = arith.maxsi %c0_i32_13, %16 : i32
      %18 = arith.minsi %c383_i32_14, %17 : i32
      %c0_i32_15 = arith.constant 0 : i32
      %19 = tpu.memref_slice %arg7[%18, %c0_i32_15] : memref<384x384xf32, #tpu.memory_space<any>> -> memref<1x384xf32, #tpu.memory_space<any>>
      %c1_i32 = arith.constant 1 : i32
      %c0_i32_16 = arith.constant 0 : i32
      %20 = tpu.memref_slice %arg12[%c1_i32, %c0_i32_16] : memref<8x384xf32, #tpu.memory_space<vmem>> -> memref<1x384xf32, #tpu.memory_space<vmem>>
      tpu.enqueue_dma source(%19 : memref<1x384xf32, #tpu.memory_space<any>>) target(%20 : memref<1x384xf32, #tpu.memory_space<vmem>>) target_semaphore(%arg14 : memref<!tpu.dma_semaphore, #tpu.memory_space<semaphore_mem>>)
      %c2 = arith.constant 2 : index
      %21 = memref.load %arg1[%c2] : memref<8xi32, #tpu.memory_space<smem>>
      %c0_i32_17 = arith.constant 0 : i32
      %c383_i32_18 = arith.constant 383 : i32
      %22 = arith.maxsi %c0_i32_17, %21 : i32
      %23 = arith.minsi %c383_i32_18, %22 : i32
      %c0_i32_19 = arith.constant 0 : i32
      %24 = tpu.memref_slice %arg7[%23, %c0_i32_19] : memref<384x384xf32, #tpu.memory_space<any>> -> memref<1x384xf32, #tpu.memory_space<any>>
      %c2_i32 = arith.constant 2 : i32
      %c0_i32_20 = arith.constant 0 : i32
      %25 = tpu.memref_slice %arg12[%c2_i32, %c0_i32_20] : memref<8x384xf32, #tpu.memory_space<vmem>> -> memref<1x384xf32, #tpu.memory_space<vmem>>
      tpu.enqueue_dma source(%24 : memref<1x384xf32, #tpu.memory_space<any>>) target(%25 : memref<1x384xf32, #tpu.memory_space<vmem>>) target_semaphore(%arg14 : memref<!tpu.dma_semaphore, #tpu.memory_space<semaphore_mem>>)
      %c3 = arith.constant 3 : index
      %26 = memref.load %arg1[%c3] : memref<8xi32, #tpu.memory_space<smem>>
      %c0_i32_21 = arith.constant 0 : i32
      %c383_i32_22 = arith.constant 383 : i32
      %27 = arith.maxsi %c0_i32_21, %26 : i32
      %28 = arith.minsi %c383_i32_22, %27 : i32
      %c0_i32_23 = arith.constant 0 : i32
      %29 = tpu.memref_slice %arg7[%28, %c0_i32_23] : memref<384x384xf32, #tpu.memory_space<any>> -> memref<1x384xf32, #tpu.memory_space<any>>
      %c3_i32 = arith.constant 3 : i32
      %c0_i32_24 = arith.constant 0 : i32
      %30 = tpu.memref_slice %arg12[%c3_i32, %c0_i32_24] : memref<8x384xf32, #tpu.memory_space<vmem>> -> memref<1x384xf32, #tpu.memory_space<vmem>>
      tpu.enqueue_dma source(%29 : memref<1x384xf32, #tpu.memory_space<any>>) target(%30 : memref<1x384xf32, #tpu.memory_space<vmem>>) target_semaphore(%arg14 : memref<!tpu.dma_semaphore, #tpu.memory_space<semaphore_mem>>)
      %c4 = arith.constant 4 : index
      %31 = memref.load %arg1[%c4] : memref<8xi32, #tpu.memory_space<smem>>
      %c0_i32_25 = arith.constant 0 : i32
      %c383_i32_26 = arith.constant 383 : i32
      %32 = arith.maxsi %c0_i32_25, %31 : i32
      %33 = arith.minsi %c383_i32_26, %32 : i32
      %c0_i32_27 = arith.constant 0 : i32
      %34 = tpu.memref_slice %arg7[%33, %c0_i32_27] : memref<384x384xf32, #tpu.memory_space<any>> -> memref<1x384xf32, #tpu.memory_space<any>>
      %c4_i32 = arith.constant 4 : i32
      %c0_i32_28 = arith.constant 0 : i32
      %35 = tpu.memref_slice %arg12[%c4_i32, %c0_i32_28] : memref<8x384xf32, #tpu.memory_space<vmem>> -> memref<1x384xf32, #tpu.memory_space<vmem>>
      tpu.enqueue_dma source(%34 : memref<1x384xf32, #tpu.memory_space<any>>) target(%35 : memref<1x384xf32, #tpu.memory_space<vmem>>) target_semaphore(%arg14 : memref<!tpu.dma_semaphore, #tpu.memory_space<semaphore_mem>>)
      %c5 = arith.constant 5 : index
      %36 = memref.load %arg1[%c5] : memref<8xi32, #tpu.memory_space<smem>>
      %c0_i32_29 = arith.constant 0 : i32
      %c383_i32_30 = arith.constant 383 : i32
      %37 = arith.maxsi %c0_i32_29, %36 : i32
      %38 = arith.minsi %c383_i32_30, %37 : i32
      %c0_i32_31 = arith.constant 0 : i32
      %39 = tpu.memref_slice %arg7[%38, %c0_i32_31] : memref<384x384xf32, #tpu.memory_space<any>> -> memref<1x384xf32, #tpu.memory_space<any>>
      %c5_i32 = arith.constant 5 : i32
      %c0_i32_32 = arith.constant 0 : i32
      %40 = tpu.memref_slice %arg12[%c5_i32, %c0_i32_32] : memref<8x384xf32, #tpu.memory_space<vmem>> -> memref<1x384xf32, #tpu.memory_space<vmem>>
      tpu.enqueue_dma source(%39 : memref<1x384xf32, #tpu.memory_space<any>>) target(%40 : memref<1x384xf32, #tpu.memory_space<vmem>>) target_semaphore(%arg14 : memref<!tpu.dma_semaphore, #tpu.memory_space<semaphore_mem>>)
      %c6 = arith.constant 6 : index
      %41 = memref.load %arg1[%c6] : memref<8xi32, #tpu.memory_space<smem>>
      %c0_i32_33 = arith.constant 0 : i32
      %c383_i32_34 = arith.constant 383 : i32
      %42 = arith.maxsi %c0_i32_33, %41 : i32
      %43 = arith.minsi %c383_i32_34, %42 : i32
      %c0_i32_35 = arith.constant 0 : i32
      %44 = tpu.memref_slice %arg7[%43, %c0_i32_35] : memref<384x384xf32, #tpu.memory_space<any>> -> memref<1x384xf32, #tpu.memory_space<any>>
      %c6_i32 = arith.constant 6 : i32
      %c0_i32_36 = arith.constant 0 : i32
      %45 = tpu.memref_slice %arg12[%c6_i32, %c0_i32_36] : memref<8x384xf32, #tpu.memory_space<vmem>> -> memref<1x384xf32, #tpu.memory_space<vmem>>
      tpu.enqueue_dma source(%44 : memref<1x384xf32, #tpu.memory_space<any>>) target(%45 : memref<1x384xf32, #tpu.memory_space<vmem>>) target_semaphore(%arg14 : memref<!tpu.dma_semaphore, #tpu.memory_space<semaphore_mem>>)
      %c7 = arith.constant 7 : index
      %46 = memref.load %arg1[%c7] : memref<8xi32, #tpu.memory_space<smem>>
      %c0_i32_37 = arith.constant 0 : i32
      %c383_i32_38 = arith.constant 383 : i32
      %47 = arith.maxsi %c0_i32_37, %46 : i32
      %48 = arith.minsi %c383_i32_38, %47 : i32
      %c0_i32_39 = arith.constant 0 : i32
      %49 = tpu.memref_slice %arg7[%48, %c0_i32_39] : memref<384x384xf32, #tpu.memory_space<any>> -> memref<1x384xf32, #tpu.memory_space<any>>
      %c7_i32 = arith.constant 7 : i32
      %c0_i32_40 = arith.constant 0 : i32
      %50 = tpu.memref_slice %arg12[%c7_i32, %c0_i32_40] : memref<8x384xf32, #tpu.memory_space<vmem>> -> memref<1x384xf32, #tpu.memory_space<vmem>>
      tpu.enqueue_dma source(%49 : memref<1x384xf32, #tpu.memory_space<any>>) target(%50 : memref<1x384xf32, #tpu.memory_space<vmem>>) target_semaphore(%arg14 : memref<!tpu.dma_semaphore, #tpu.memory_space<semaphore_mem>>)
      %c0_41 = arith.constant 0 : index
      %c0_42 = arith.constant 0 : index
      %51 = vector.load %arg3[%c0_41, %c0_42] : memref<8x128xf32, #tpu.memory_space<vmem>>, vector<8x128xf32>
      %c0_43 = arith.constant 0 : index
      %c0_44 = arith.constant 0 : index
      %52 = vector.load %arg4[%c0_43, %c0_44] : memref<128x384xf32, #tpu.memory_space<vmem>>, vector<128x384xf32>
      %cst_45 = arith.constant dense<0.000000e+00> : vector<8x384xf32>
      %53 = tpu.matmul %51, %52, %cst_45 {dimension_numbers = #tpu.dot_dimension_numbers<[1], [0], [0], [1], [0, 0, 1, 1], [], []>} : vector<8x128xf32>, vector<128x384xf32>, vector<8x384xf32> -> vector<8x384xf32>
      %c0_46 = arith.constant 0 : index
      %c0_47 = arith.constant 0 : index
      %54 = vector.load %arg6[%c0_46, %c0_47] : memref<1x384xf32, #tpu.memory_space<vmem>>, vector<1x384xf32>
      %55 = vector.broadcast %54 : vector<1x384xf32> to vector<8x384xf32>
      %56 = arith.addf %53, %55 : vector<8x384xf32>
      tpu.wait_dma2 semaphore(%arg14 : memref<!tpu.dma_semaphore, #tpu.memory_space<semaphore_mem>>) src(%arg12 : memref<8x384xf32, #tpu.memory_space<vmem>>) dst(%arg12 : memref<8x384xf32, #tpu.memory_space<vmem>>)
      %c0_48 = arith.constant 0 : index
      %c0_49 = arith.constant 0 : index
      %57 = vector.load %arg12[%c0_48, %c0_49] : memref<8x384xf32, #tpu.memory_space<vmem>>, vector<8x384xf32>
      %c0_50 = arith.constant 0 : index
      %c0_51 = arith.constant 0 : index
      %58 = vector.load %arg2[%c0_50, %c0_51] : memref<8x1xf32, #tpu.memory_space<vmem>>, vector<8x1xf32>
      %59 = vector.broadcast %58 : vector<8x1xf32> to vector<8x384xf32>
      %60 = arith.mulf %57, %59 : vector<8x384xf32>
      %c0_52 = arith.constant 0 : index
      %c0_53 = arith.constant 0 : index
      %61 = vector.load %arg5[%c0_52, %c0_53] : memref<1x384xf32, #tpu.memory_space<vmem>>, vector<1x384xf32>
      %62 = vector.broadcast %61 : vector<1x384xf32> to vector<8x384xf32>
      %63 = arith.addf %60, %62 : vector<8x384xf32>
      %64 = vector.extract_strided_slice %63 {offsets = [0, 0], sizes = [8, 128], strides = [1, 1]} : vector<8x384xf32> to vector<8x128xf32>
      %65 = vector.extract_strided_slice %56 {offsets = [0, 0], sizes = [8, 128], strides = [1, 1]} : vector<8x384xf32> to vector<8x128xf32>
      %66 = arith.addf %64, %65 : vector<8x128xf32>
      %67 = arith.negf %66 : vector<8x128xf32>
      %68 = math.exp %67 : vector<8x128xf32>
      %cst_54 = arith.constant 1.000000e+00 : f32
      %69 = vector.broadcast %cst_54 : f32 to vector<8x128xf32>
      %70 = arith.addf %69, %68 : vector<8x128xf32>
      %71 = arith.divf %69, %70 : vector<8x128xf32>
      %72 = vector.extract_strided_slice %63 {offsets = [0, 128], sizes = [8, 128], strides = [1, 1]} : vector<8x384xf32> to vector<8x128xf32>
      %73 = vector.extract_strided_slice %56 {offsets = [0, 128], sizes = [8, 128], strides = [1, 1]} : vector<8x384xf32> to vector<8x128xf32>
      %74 = arith.addf %72, %73 : vector<8x128xf32>
      %75 = arith.negf %74 : vector<8x128xf32>
      %76 = math.exp %75 : vector<8x128xf32>
      %cst_55 = arith.constant 1.000000e+00 : f32
      %77 = vector.broadcast %cst_55 : f32 to vector<8x128xf32>
      %78 = arith.addf %77, %76 : vector<8x128xf32>
      %79 = arith.divf %77, %78 : vector<8x128xf32>
      %80 = vector.extract_strided_slice %63 {offsets = [0, 256], sizes = [8, 128], strides = [1, 1]} : vector<8x384xf32> to vector<8x128xf32>
      %81 = vector.extract_strided_slice %56 {offsets = [0, 256], sizes = [8, 128], strides = [1, 1]} : vector<8x384xf32> to vector<8x128xf32>
      %82 = arith.mulf %71, %81 : vector<8x128xf32>
      %83 = arith.addf %80, %82 : vector<8x128xf32>
      %84 = math.tanh %83 : vector<8x128xf32>
      %cst_56 = arith.constant 1.000000e+00 : f32
      %85 = vector.broadcast %cst_56 : f32 to vector<8x128xf32>
      %86 = arith.subf %85, %79 : vector<8x128xf32>
      %87 = arith.mulf %86, %84 : vector<8x128xf32>
      %88 = arith.mulf %79, %51 : vector<8x128xf32>
      %89 = arith.addf %87, %88 : vector<8x128xf32>
      %c0_57 = arith.constant 0 : index
      %c0_58 = arith.constant 0 : index
      %90 = vector.load %arg11[%c0_57, %c0_58] : memref<8x128xf32, #tpu.memory_space<vmem>>, vector<8x128xf32>
      tpu.vector_store %arg11[%c0_57, %c0_58], %89 {strides = array<i32>} : memref<8x128xf32, #tpu.memory_space<vmem>>, vector<8x128xf32>,
      %c0_59 = arith.constant 0 : index
      %c0_60 = arith.constant 0 : index
      %91 = vector.load %arg13[%c0_59, %c0_60] : memref<8x128xf32, #tpu.memory_space<vmem>>, vector<8x128xf32>
      tpu.vector_store %arg13[%c0_59, %c0_60], %89 {strides = array<i32>} : memref<8x128xf32, #tpu.memory_space<vmem>>, vector<8x128xf32>,
    } else {
    }
    %c0 = arith.constant 0 : index
    %c0_1 = arith.constant 0 : index
    %3 = vector.load %arg13[%c0, %c0_1] : memref<8x128xf32, #tpu.memory_space<vmem>>, vector<8x128xf32>
    %c0_2 = arith.constant 0 : index
    %c0_3 = arith.constant 0 : index
    %4 = vector.load %arg8[%c0_2, %c0_3] : memref<128x128xf32, #tpu.memory_space<vmem>>, vector<128x128xf32>
    %cst = arith.constant dense<0.000000e+00> : vector<8x128xf32>
    %5 = tpu.matmul %3, %4, %cst {dimension_numbers = #tpu.dot_dimension_numbers<[1], [0], [0], [1], [0, 0, 1, 1], [], []>} : vector<8x128xf32>, vector<128x128xf32>, vector<8x128xf32> -> vector<8x128xf32>
    %c0_4 = arith.constant 0 : index
    %c0_5 = arith.constant 0 : index
    %6 = vector.load %arg9[%c0_4, %c0_5] : memref<1x128xf32, #tpu.memory_space<vmem>>, vector<1x128xf32>
    %7 = vector.broadcast %6 : vector<1x128xf32> to vector<8x128xf32>
    %8 = arith.addf %5, %7 : vector<8x128xf32>
    %9 = math.tanh %8 : vector<8x128xf32>
    %c0_6 = arith.constant 0 : index
    %c0_7 = arith.constant 0 : index
    %10 = vector.load %arg10[%c0_6, %c0_7] : memref<8x128xf32, #tpu.memory_space<vmem>>, vector<8x128xf32>
    tpu.vector_store %arg10[%c0_6, %c0_7], %9 {strides = array<i32>} : memref<8x128xf32, #tpu.memory_space<vmem>>, vector<8x128xf32>,
    return
  }
  func.func @transform_0(%arg0: i32, %arg1: memref<8xi32, #tpu.memory_space<smem>>) -> (i32, i32) {
    %c0_i32 = arith.constant 0 : i32
    %c0_i32_0 = arith.constant 0 : i32
    %c0_i32_1 = arith.constant 0 : i32
    return %c0_i32, %c0_i32_0 : i32, i32
  }
  func.func @transform_1(%arg0: i32, %arg1: memref<8xi32, #tpu.memory_space<smem>>) -> (i32, i32) {
    %c0_i32 = arith.constant 0 : i32
    %c0_i32_0 = arith.constant 0 : i32
    %c0_i32_1 = arith.constant 0 : i32
    return %c0_i32, %c0_i32_0 : i32, i32
  }
  func.func @transform_2(%arg0: i32, %arg1: memref<8xi32, #tpu.memory_space<smem>>) -> (i32, i32) {
    %c0_i32 = arith.constant 0 : i32
    %c0_i32_0 = arith.constant 0 : i32
    %c0_i32_1 = arith.constant 0 : i32
    return %c0_i32, %c0_i32_0 : i32, i32
  }
  func.func @transform_3(%arg0: i32, %arg1: memref<8xi32, #tpu.memory_space<smem>>) -> (i32, i32) {
    %c0_i32 = arith.constant 0 : i32
    %c0_i32_0 = arith.constant 0 : i32
    %c0_i32_1 = arith.constant 0 : i32
    return %c0_i32, %c0_i32_0 : i32, i32
  }
  func.func @transform_4(%arg0: i32, %arg1: memref<8xi32, #tpu.memory_space<smem>>) -> (i32, i32) {
    %c0_i32 = arith.constant 0 : i32
    %c0_i32_0 = arith.constant 0 : i32
    %c0_i32_1 = arith.constant 0 : i32
    return %c0_i32, %c0_i32_0 : i32, i32
  }
  func.func @transform_6(%arg0: i32, %arg1: memref<8xi32, #tpu.memory_space<smem>>) -> (i32, i32) {
    %c0_i32 = arith.constant 0 : i32
    %c0_i32_0 = arith.constant 0 : i32
    return %c0_i32, %arg0 : i32, i32
  }
  func.func @transform_7(%arg0: i32, %arg1: memref<8xi32, #tpu.memory_space<smem>>) -> (i32, i32) {
    %c0_i32 = arith.constant 0 : i32
    %c0_i32_0 = arith.constant 0 : i32
    return %c0_i32, %arg0 : i32, i32
  }
  func.func @transform_8(%arg0: i32, %arg1: memref<8xi32, #tpu.memory_space<smem>>) -> (i32, i32) {
    %c0_i32 = arith.constant 0 : i32
    %c0_i32_0 = arith.constant 0 : i32
    return %c0_i32, %arg0 : i32, i32
  }
  func.func @transform_9(%arg0: i32, %arg1: memref<8xi32, #tpu.memory_space<smem>>) -> (i32, i32) {
    %c0_i32 = arith.constant 0 : i32
    %c0_i32_0 = arith.constant 0 : i32
    %c0_i32_1 = arith.constant 0 : i32
    return %c0_i32, %c0_i32_0 : i32, i32
  }
}

</mosaic_0001>

<bundles_post_ra>
// kernel: tpu_custom_call.1
= control target key start
LH: loop header
LB: loop body
LE: loop exit
PB: predicated region body
PF: predicated region fallthrough
CT: control target
= control target key end

     0   :  { %s2339_s0 = inlined_call_operand.vmem [shape: s32[8], index: 0, kind: input, shape index: {}]   ;;  %s2340_s1 = inlined_call_operand.vmem [shape: f32[8,1], index: 1, kind: input, shape index: {}]   ;;  %s2341_s2 = inlined_call_operand.vmem [shape: f32[8,128], index: 2, kind: input, shape index: {}]   ;;  %s2342_s3 = inlined_call_operand.hbm [shape: f32[128,384], index: 3, kind: input, shape index: {}]   ;;  %s2343_s4 = inlined_call_operand.vmem [shape: f32[1,384], index: 4, kind: input, shape index: {}]   ;;  %s2344_s5 = inlined_call_operand.vmem [shape: f32[1,384], index: 5, kind: input, shape index: {}]   ;;  %s2345_s6 = inlined_call_operand.hbm [shape: f32[384,384], index: 6, kind: input, shape index: {}]   ;;  %s2346_s7 = inlined_call_operand.hbm [shape: f32[128,384], index: 7, kind: input, shape index: {}]   ;;  %s2347_s8 = inlined_call_operand.vmem [shape: f32[1,384], index: 8, kind: input, shape index: {}]   ;;  %s2348_s9 = inlined_call_operand.hbm [shape: f32[8,384], index: 9, kind: output, shape index: {0}]   ;;  %s2349_s10 = inlined_call_operand.hbm [shape: f32[8,128], index: 10, kind: output, shape index: {1}]  }
   0x1   :  { %2376 = sst [smem:[#allocation41_spill]] %s2341_s2  ;;  %s16_s15 = sshll.u32 %s2339_s0, 4  ;;  %s17_s15 = int_to_ptr.vmem [resolvable:$true] %s16_s15 }
   0x2   :  { %2377 = sst [smem:[#allocation42_spill]] %s2342_s3  ;;  %s1400_s16 = scalar_lea.vmem %s17_s15, 16 }
   0x3   :  { %2378 = sst [smem:[#allocation43_spill]] %s2346_s7  ;;  %p1401_p0 = scmp.ne.s32.totalorder %s17_s15, %s1400_s16 }
   0x4   :  { %2379 = sst [smem:[#allocation44_spill]] %s2347_s8  ;;  %p1405_p1 = scmp.lt.s32.totalorder %s17_s15, %s17_s15 }
   0x5   :  { %2380 = sst [smem:[#allocation45_spill]] %s2348_s9  ;;  %p1406_p2 = scmp.lt.s32.totalorder %s1400_s16, %s1400_s16 }
   0x6   :  { %2381 = sst [smem:[#allocation46_spill]] %s2349_s10 }
   0x7   :  { %p1407_p3 = por %p1406_p2, %p1405_p1 }
   0x9   :  { %p1408_p4 = pnand %p1407_p3, %p1401_p0 }
   0xb   :  { %1411 = shalt.err (!%p1408_p4)  }
   0xc   :  { %s1768_s17 = smov [#allocation6]  }
   0xd   :  { %19 = dma.vmem_to_smem %s17_s15, 16, %s1768_s17, [#allocation5] }
   0xe   :  { %1732 = dma.done.wait [#allocation5], 16 }
   0xf   :  { %1733 = vsyncadd [#allocation5], 4294967280 }
  0x10   :  { %21 = sfence }
  0x11   :  { %22 = vsyncpa [#allocation8], 0 }
  0x12   :  { %23 = vsyncpa [#allocation11], 0 }
  0x13   :  { %25 = vsyncpa [#allocation11 + $0x1], 0 }
  0x14   :  { %26 = vsyncpa [#allocation9], 0 }
  0x15   :  { %28 = vsyncpa [#allocation9 + $0x1], 0 }
  0x16   :  { %29 = vsyncpa [#allocation14], 0  ;;  %s1852_s0 = smov 0   ;;  %s1854_s18 = smov 0  }
  0x17   :  { %s1856_s19 = smov 0   ;;  %s1858_s20 = smov 0  }
  0x18 LB: > { %2382 = sst [smem:[#allocation29_spill]] %s1754_s0  ;;  %s1873_s21 = sadd.s32 4294967295, %s1766_s20   ;;  %s1766_s20 = sphi %s1858_s20, %s2435_s20   ;;  %s1762_s19 = sphi %s1856_s19, %s2438_s19   ;;  %s1758_s18 = sphi %s1854_s18, %s2437_s18   ;;  %s1754_s0 = sphi %s1852_s0, %s2436_s0  }
  0x19   : > { %2383 = sst [smem:[#allocation30_spill]] %s1758_s18  ;;  %s1025_s22 = sadd.s32 4294967294, %s1766_s20  }
  0x1a   : > { %2384 = sst [smem:[#allocation31_spill]] %s1762_s19  ;;  %s1877_s23 = sadd.s32 1, %s1766_s20  }
  0x1b   : > { %2385 = sst [smem:[#allocation32_spill]] %s1766_s20  ;;  %s147_s24 = sadd.s32 1, %s1762_s19 }
  0x1c   : > { %2386 = sst [smem:[#allocation33_spill]] %s1873_s21  ;;  %s144_s25 = ssub.s32 %s1766_s20, %s1877_s23 }
  0x1d   : > { %2387 = sst [smem:[#allocation34_spill]] %s1877_s23  ;;  %p154_p5 = scmp.ne.s32.totalorder %s1762_s19, %s1758_s18 }
  0x1e   : > { %p145_p6 = scmp.eq.s32.totalorder %s144_s25, 0  ;;  %p155_p7 = scmp.eq.s32.totalorder %s1766_s20, 0 }
  0x1f   : > { %p160_p8 = scmp.ne.s32.totalorder %s1758_s18, %s1754_s0  ;;  %p2353_p9 = scmp.eq.s32.totalorder %s1873_s21, 0 }
  0x20   : > { %s1889_s26 = scalar_select %p145_p6, %s1762_s19, %s147_s24  }
  0x21   : > { %p1891_p10 = por %p155_p7, %p154_p5  ;;  %p1897_p11 = por %p2353_p9, %p160_p8 }
  0x22   : > { %2388 = sst [smem:[#allocation35_spill]] %s1889_s26  ;;  %p2350_p12 = scmp.eq.s32.totalorder %s1873_s21, 2 }
  0x23   : > { %s2389_s27 = scalar_select %p1891_p10, 1, 0 }
  0x24   : > { %s2390_s28 = scalar_select %p1897_p11, 1, 0 }
  0x25   : > { %p216_p13 = scmp.eq.s32.totalorder %s1025_s22, 2  ;;  %p1026_p0 = scmp.ge.s32.totalorder %s1766_s20, 1 }
  0x26   : > { %p244_p1 = scmp.lt.s32.totalorder %s1766_s20, 4  ;;  %p1906_p2 = por %p2350_p12, %p154_p5 }
  0x27   : > { %p1910_p3 = por %p216_p13, %p160_p8  ;;  %s1769_s12 = smov [#allocation7]  }
  0x28   : > { %s2391_s29 = scalar_select %p1906_p2, 1, 0 }
  0x29   : > { %s2393_s30 = scalar_select %p1910_p3, 1, 0 }
  0x2a   : > { %2392 = sst [smem:[#allocation36_spill]] %s2391_s29  ;;  %p1914_p4 = pnand %p1026_p0, %p244_p1 }
  0x2b   : > { %2394 = sst [smem:[#allocation37_spill]] %s2393_s30  ;;  %s262_s13 = sshll.u32 %s1769_s12, 4  ;;  %s263_s13 = int_to_ptr.vmem [resolvable:$true] %s262_s13 }
  0x2c   : > { %s2395_s11 = scalar_select %p1914_p4, 1, 0 }
  0x2d   : > { %p1313_p7 = pneg %p1914_p4  ;;  %s282_s15 = sand.u32 1, %s1762_s19  }
  0x2e   : > { %s2397_s3 = sld [smem:[#allocation42_spill]] }
  0x2f   : > { %p1923_p5 = pnand %p1313_p7, %p2353_p9 }
  0x31   : > { %p1414_p0 = pneg %p1923_p5 }
  0x34   : > { %s1412_s22 = scalar_lea.hbm %s2397_s3, 6144 }
  0x35   : > { %p1413_p13 = scmp.ne.s32.totalorder %s2397_s3, %s1412_s22  ;;  %p1419_p7 = scmp.lt.u32.totalorder %s1412_s22, %s2397_s3 }
  0x37   : > { %p1415_p1 = pnand %p1414_p0, %p1413_p13 }
  0x39   : > { %p1416_p12 = pneg %p1415_p1 }
  0x3b   : > { %p1421_p6 = pnand %p1419_p7, %p1416_p12 }
  0x3d   : > { %1424 = shalt.err (!%p1421_p6)
}
  0x3e   : > { %s1425_s23 = scalar_lea.vmem %s263_s13, 6144  ;;  %p1433_p2 = scmp.lt.s32.totalorder %s263_s13, %s263_s13 }
  0x3f   : > { %p1426_p9 = scmp.ne.s32.totalorder %s263_s13, %s1425_s23  ;;  %p1434_p11 = scmp.lt.s32.totalorder %s1425_s23, %s1425_s23 }
  0x41   : > { %p1428_p8 = pnand %p1426_p9, %p1414_p0  ;;  %p1435_p4 = por %p1434_p11, %p1433_p2 }
  0x43   : > { %p1429_p3 = pneg %p1428_p8 }
  0x45   : > { %p1436_p10 = pnand %p1435_p4, %p1429_p3 }
  0x47   : > { %1439 = shalt.err (!%p1436_p10)
}
  0x48   : > { %s2358_s16 = smov 384   ;;  %s1771_s17 = smov 24  }
  0x49   : > { %1316 = dma.hbm_to_vmem [thread:$0]  (!%p1923_p5), %s2397_s3, 6144, %s263_s13, [#allocation8], %s2358_s16, %s2358_s16, %s1771_s17  }
  0x4a   : > { %p2398_p9 = scmp.ne.s32.totalorder %s2389_s27, 0  ;;  %p2399_p12 = scmp.lt.s32.totalorder %s1766_s20, 3 }
  0x4b   : > { %s1029_s24 = sshll.u32 %s282_s15, 7  ;;  %s1030_s25 = sshll.u32 %s1766_s20, 7 }
  0x4c   : > { %p1951_p6 = pnand %p2399_p12, %p2398_p9  ;;  %s2401_s7 = sld [smem:[#allocation43_spill]] }
  0x4d   : > { %s286_s13 = scalar_lea.vmem [#allocation10], %s1029_s24  ;;  %s1963_s17 = scalar_lea.sflag [#allocation11], %s282_s15 }
  0x4e   : > { %s292_s27 = sshll.u32 %s286_s13, 4  ;;  %p1442_p11 = pneg %p1951_p6  ;;  %s1961_s27 = int_to_ptr.vmem [resolvable:$true] %s292_s27 }
  0x52   : > { %s1959_s14 = scalar_lea.hbm %s2401_s7, %s1030_s25  ;;  %s1445_s25 = scalar_lea.hbm %s2401_s7, 6144 }
  0x53   : > { %s1440_s26 = scalar_lea.hbm %s1959_s14, 2048  ;;  %p1446_p4 = scmp.lt.u32.totalorder %s1959_s14, %s2401_s7 }
  0x54   : > { %p1441_p10 = scmp.ne.s32.totalorder %s1959_s14, %s1440_s26  ;;  %p1447_p5 = scmp.lt.u32.totalorder %s1445_s25, %s1440_s26 }
  0x55   : > { %p1449_p13 = scmp.lt.u32.totalorder %s1440_s26, %s1959_s14 }
  0x56   : > { %p1443_p2 = pnand %p1442_p11, %p1441_p10  ;;  %p1448_p8 = por %p1447_p5, %p1446_p4 }
  0x58   : > { %p1444_p3 = pneg %p1443_p2  ;;  %p1450_p0 = por %p1449_p13, %p1448_p8 }
  0x5a   : > { %p1451_p1 = pnand %p1450_p0, %p1444_p3 }
  0x5c   : > { %1454 = shalt.err (!%p1451_p1)
}
  0x5d   : > { %s1455_s15 = scalar_lea.vmem %s1961_s27, 2048  ;;  %s1772_s24 = smov [#allocation10]  }
  0x5e   : > { %p1456_p7 = scmp.ne.s32.totalorder %s1961_s27, %s1455_s15  ;;  %s1460_s13 = sshll.u32 %s1772_s24, 4  ;;  %s1461_s13 = int_to_ptr.vmem [resolvable:$false] %s1460_s13 }
  0x5f   : > { %s1462_s16 = scalar_lea.vmem %s1461_s13, 4096  ;;  %p1463_p10 = scmp.lt.s32.totalorder %s1961_s27, %s1461_s13 }
  0x60   : > { %p1458_p9 = pnand %p1456_p7, %p1442_p11  ;;  %p1464_p2 = scmp.lt.s32.totalorder %s1462_s16, %s1455_s15 }
  0x62   : > { %p1459_p12 = pneg %p1458_p9  ;;  %p1465_p4 = por %p1464_p2, %p1463_p10 }
  0x64   : > { %p1466_p5 = pnand %p1465_p4, %p1459_p12 }
  0x66   : > { %1469 = shalt.err (!%p1466_p5)
}
  0x67   : > { %s1773_s26 = smov 128   ;;  %s1774_s19 = smov 8  }
  0x68   : > { %s2402_s22 = smov 384   ;;  %p2403_p11 = scmp.ne.s32.totalorder %s2395_s11, 0 }
  0x69   : > { %1320 = dma.hbm_to_vmem [thread:$0]  (!%p1951_p6), %s1959_s14, 2048, %s1961_s27, %s1963_s17, %s2402_s22, %s1773_s26, %s1774_s19  }
  0x6a   : > { %310 = sbr.rel (%p2403_p11) target bundleno = 889 (0x379), region = 48 }
  0x71   : > { %p2404_p3 = scmp.eq.s32.totalorder %s1873_s21, 0 }
  0x73   : > { %1735 = dma.done.wait (%p2404_p3), [#allocation8], 6144   ;;  %p2405_p8 = pmov %p2404_p3 }
  0x74   : > { %s1999_s25 = sand.u32 1, %s1758_s18   ;;  %p2407_p6 = scmp.ne.s32.totalorder %s2390_s28, 0 }
  0x75   : > { %1737 = vsyncadd (%p2405_p8), [#allocation8], 4294961152  ;;  %2406 = sst [smem:[#allocation38_spill]] %s1999_s25  ;;  %s1033_s12 = sshll.u32 %s1999_s25, 7 }
  0x76   : > { %s317_s15 = scalar_lea.sflag [#allocation11], %s1999_s25  ;;  %s2003_s23 = scalar_lea.vmem [#allocation10], %s1033_s12 }
  0x77   : > { %1739 = dma.done.wait (%p2407_p6), %s317_s15, 2048  }
  0x78   : > { %1741 = vsyncadd (%p2407_p6), %s317_s15, 4294965248  ;;  %s1034_s11 = sshll.u32 %s1999_s25, 3  ;;  %p356_p13 = scmp.lt.s32.totalorder %s1873_s21, 2 }
  0x79   : > { %s2018_s13 = scalar_lea.vmem [#allocation12], %s1034_s11  ;;  %p2411_p0 = scmp.ne.s32.totalorder %s1873_s21, 0 }
  0x7a   : > { %s2012_s14 = scalar_select %p356_p13, %s1873_s21, 2 }
  0x7b   : > { %2410 = sst [smem:[#allocation40_spill]] %s2018_s13  ;;  %362 = sbr.rel (%p2411_p0) target bundleno = 611 (0x263), region = 60  ;;  %v500_v0 = vld [vmem:[#allocation7 + $0x8] sm:$0xff] (!%p2411_p0)  ;;  %v503_v1 = vld [vmem:[#allocation7 + $0x20] sm:$0xff] (!%p2411_p0)  ;;  %v1775_v4 = vmov (!%p2411_p0), 0.0|0.0   ;;  %v502_v5 = vld [vmem:[#allocation7 + $0x18] sm:$0xff] (!%p2411_p0) }
  0x7c   : > { %2408 = sst [smem:[#allocation39_spill]] %s2012_s14  ;;  %v499_v2 = vld [vmem:[#allocation7] sm:$0xff] (!%p2411_p0)  ;;  %v1221_v3 = vpack.c.bf16 (!%p2411_p0), %v503_v1, %v500_v0  ;;  %1253 = vmatprep.subr.bf16.mxu1 (!%p2411_p0), %v1775_v4  ;;  %v501_v6 = vld [vmem:[#allocation7 + $0x10] sm:$0xff] (!%p2411_p0)  ;;  %v504_v7 = vld [vmem:[#allocation7 + $0x28] sm:$0xff] (!%p2411_p0)  ;;  %v1776_v8 = vmov (!%p2411_p0), 0.0   ;;  %vm1777_vm0 = vmmov (!%p2411_p0), 0  }
  0x7d   : > { %628 = vmatprep.mubr.f32.mxu0 (!%p2411_p0), %v1776_v8  ;;  %s2023_s28 = sld [smem:[#allocation6]] (!%p2411_p0)  ;;  %v1223_v9 = vpack.c.bf16 (!%p2411_p0), %v502_v5, %v499_v2  ;;  %v1254_v10 = vpack.c.bf16 (!%p2411_p0), %v504_v7, %v501_v6  ;;  %v506_v11 = vld [vmem:[#allocation7 + $0x38] sm:$0xff] (!%p2411_p0)  ;;  %v509_v12 = vld [vmem:[#allocation7 + $0x50] sm:$0xff] (!%p2411_p0)  ;;  %1183 = vmatprep.mubr.msk.f32.mxu1 (!%p2411_p0), %vm1777_vm0, %v1776_v8  ;;  %s1778_s16 = smov (!%p2411_p0), [#allocation2]   ;;  %v508_v15 = vld [vmem:[#allocation7 + $0x48] sm:$0xff] (!%p2411_p0) }
  0x7e   : > { %v505_v13 = vld [vmem:[#allocation7 + $0x30] sm:$0xff] (!%p2411_p0)  ;;  %s375_s26 = sshll.u32 (!%p2411_p0), %s1778_s16, 4  ;;  %1222 = vmatprep.subr.bf16.mxu0 (!%p2411_p0), %v1221_v3  ;;  %v1225_v14 = vpack.c.bf16 (!%p2411_p0), %v509_v12, %v506_v11  ;;  %v507_v16 = vld [vmem:[#allocation7 + $0x40] sm:$0xff] (!%p2411_p0)  ;;  %v510_v17 = vld [vmem:[#allocation7 + $0x58] sm:$0xff] (!%p2411_p0)  ;;  %s2027_s19 = sld [smem:[#allocation6 + $0x1]] (!%p2411_p0)  ;;  %s2025_s26 = int_to_ptr.vmem [resolvable:$true] %s375_s26 }
  0x7f   : > { %1224 = vmatpush1.bf16.msra.mxu0 (!%p2411_p0), %v1223_v9  ;;  %1255 = vmatpush3.bf16.msra.mxu1 (!%p2411_p0), %v1254_v10  ;;  %v1227_v18 = vpack.c.bf16 (!%p2411_p0), %v508_v15, %v505_v13  ;;  %v1257_v19 = vpack.c.bf16 (!%p2411_p0), %v510_v17, %v507_v16  ;;  %v512_v20 = vld [vmem:[#allocation7 + $0x68] sm:$0xff] (!%p2411_p0)  ;;  %v515_v21 = vld [vmem:[#allocation7 + $0x80] sm:$0xff] (!%p2411_p0)  ;;  %v514_v24 = vld [vmem:[#allocation7 + $0x78] sm:$0xff] (!%p2411_p0)  ;;  %s1779_s22 = smov (!%p2411_p0), [#allocation2 + $0x1]   ;;  %s2030_s15 = sld [smem:[#allocation6 + $0x2]] (!%p2411_p0) }
  0x80   : > { %v511_v22 = vld [vmem:[#allocation7 + $0x60] sm:$0xff] (!%p2411_p0)  ;;  %1226 = vmatprep.subr.bf16.mxu0 (!%p2411_p0), %v1225_v14  ;;  %1256 = vmatprep.subr.bf16.mxu1 (!%p2411_p0), %v1775_v4  ;;  %v1229_v23 = vpack.c.bf16 (!%p2411_p0), %v515_v21, %v512_v20  ;;  %v513_v25 = vld [vmem:[#allocation7 + $0x70] sm:$0xff] (!%p2411_p0)  ;;  %v516_v26 = vld [vmem:[#allocation7 + $0x88] sm:$0xff] (!%p2411_p0)  ;;  %s392_s12 = sshll.u32 (!%p2411_p0), %s1779_s22, 4  ;;  %s1780_s11 = smov (!%p2411_p0), [#allocation2 + $0x2]   ;;  %s2032_s12 = int_to_ptr.vmem [resolvable:$true] %s392_s12 }
  0x81   : > { %v518_v27 = vld [vmem:[#allocation7 + $0x98] sm:$0xff] (!%p2411_p0)  ;;  %v521_v28 = vld [vmem:[#allocation7 + $0xb0] sm:$0xff] (!%p2411_p0)  ;;  %v1231_v29 = vpack.c.bf16 (!%p2411_p0), %v514_v24, %v511_v22  ;;  %v1260_v30 = vpack.c.bf16 (!%p2411_p0), %v516_v26, %v513_v25  ;;  %s2036_s27 = sshll.u32 (!%p2411_p0), %s1780_s11, 4  ;;  %s2038_s17 = sld [smem:[#allocation6 + $0x3]] (!%p2411_p0)  ;;  %v520_v33 = vld [vmem:[#allocation7 + $0xa8] sm:$0xff] (!%p2411_p0)  ;;  %s2086_s27 = int_to_ptr.vmem [resolvable:$true] %s2036_s27 }
  0x82   : > { %v517_v31 = vld [vmem:[#allocation7 + $0x90] sm:$0xff]  ;;  %v1233_v32 = vpack.c.bf16 %v521_v28, %v518_v27  ;;  %v519_v34 = vld [vmem:[#allocation7 + $0xa0] sm:$0xff]  ;;  %v522_v35 = vld [vmem:[#allocation7 + $0xb8] sm:$0xff]  ;;  %s2065_s20 = scalar_lea.hbm %s2345_s6, 18432 }
  0x83   : > { %p364_p1 = scmp.gt.s32.totalorder %s2023_s28, 0  ;;  %p1036_p7 = scmp.lt.s32.totalorder %s2023_s28, 383  ;;  %1228 = vmatpush1.bf16.msra.mxu0 %v1227_v18  ;;  %1258 = vmatpush3.bf16.msra.mxu1 %v1257_v19  ;;  %v524_v36 = vld [vmem:[#allocation7 + $0xc8] sm:$0xff]  ;;  %v527_v37 = vld [vmem:[#allocation7 + $0xe0] sm:$0xff]  ;;  %v1235_v38 = vpack.c.bf16 %v520_v33, %v517_v31  ;;  %v1263_v39 = vpack.c.bf16 %v522_v35, %v519_v34  ;;  %v526_v42 = vld [vmem:[#allocation7 + $0xd8] sm:$0xff] }
  0x84   : > { %1230 = vmatprep.subr.bf16.mxu0 %v1229_v23  ;;  %1259 = vmatprep.subr.bf16.mxu1 %v1775_v4  ;;  %p380_p9 = scmp.gt.s32.totalorder %s2027_s19, 0  ;;  %p1043_p12 = scmp.lt.s32.totalorder %s2027_s19, 383  ;;  %v523_v40 = vld [vmem:[#allocation7 + $0xc0] sm:$0xff]  ;;  %v1237_v41 = vpack.c.bf16 %v527_v37, %v524_v36  ;;  %v525_v43 = vld [vmem:[#allocation7 + $0xd0] sm:$0xff]  ;;  %v528_v44 = vld [vmem:[#allocation7 + $0xe8] sm:$0xff] }
  0x85   : > { %s365_s16 = scalar_select %p364_p1, %s2023_s28, 0  ;;  %v530_v45 = vld [vmem:[#allocation7 + $0xf8] sm:$0xff]  ;;  %v533_v46 = vld [vmem:[#allocation7 + $0x110] sm:$0xff]  ;;  %v1239_v47 = vpack.c.bf16 %v526_v42, %v523_v40  ;;  %v1266_v48 = vpack.c.bf16 %v528_v44, %v525_v43  ;;  %v532_v51 = vld [vmem:[#allocation7 + $0x108] sm:$0xff] }
  0x86   : > { %s381_s22 = scalar_select %p380_p9, %s2027_s19, 0  ;;  %v529_v49 = vld [vmem:[#allocation7 + $0xf0] sm:$0xff]  ;;  %v1241_v50 = vpack.c.bf16 %v533_v46, %v530_v45  ;;  %v531_v52 = vld [vmem:[#allocation7 + $0x100] sm:$0xff]  ;;  %v534_v53 = vld [vmem:[#allocation7 + $0x118] sm:$0xff] }
  0x87   : > { %s2440_s16 = smov (!%p1036_p7, %s365_s16), 383  ;;  %1232 = vmatpush1.bf16.msra.mxu0 %v1231_v29  ;;  %1261 = vmatpush3.bf16.msra.mxu1 %v1260_v30  ;;  %p397_p10 = scmp.gt.s32.totalorder %s2030_s15, 0  ;;  %v536_v54 = vld [vmem:[#allocation7 + $0x128] sm:$0xff]  ;;  %v539_v55 = vld [vmem:[#allocation7 + $0x140] sm:$0xff] }
  0x88   : > { %1234 = vmatprep.subr.bf16.mxu0 %v1233_v32  ;;  %1262 = vmatprep.subr.bf16.mxu1 %v1775_v4  ;;  %s368_s11 = sshrl.u32 %s2440_s16, 3  ;;  %s369_s24 = sand.u32 7, %s2440_s16  }
  0x89   : > { %s370_s28 = smul.u32 24, %s368_s11  ;;  %s2442_s22 = smov (!%p1043_p12, %s381_s22), 383 }
  0x8a   : > { %p1050_p2 = scmp.lt.s32.totalorder %s2030_s15, 383  ;;  %s384_s19 = sshrl.u32 %s2442_s22, 3 }
  0x8b   : > { %1236 = vmatpush1.bf16.msra.mxu0 %v1235_v38  ;;  %1264 = vmatpush3.bf16.msra.mxu1 %v1263_v39  ;;  %s371_s3 = sadd.s32 %s370_s28, %s369_s24  ;;  %s385_s30 = sand.u32 7, %s2442_s22  }
  0x8c   : > { %1238 = vmatprep.subr.bf16.mxu0 %v1237_v41  ;;  %1265 = vmatprep.subr.bf16.mxu1 %v1775_v4  ;;  %s1041_s16 = sshll.u32 %s371_s3, 4 }
  0x8d   : > { %s373_s18 = scalar_lea.hbm %s2345_s6, %s1041_s16 }
  0x8e   : > { %s1470_s0 = scalar_lea.hbm %s373_s18, 48  ;;  %p1473_p5 = scmp.lt.u32.totalorder %s373_s18, %s2345_s6 }
  0x8f   : > { %p1471_p4 = scmp.ne.s32.totalorder %s373_s18, %s1470_s0  ;;  %p1474_p11 = scmp.lt.u32.totalorder %s2065_s20, %s1470_s0 }
  0x90   : > { %p1476_p8 = scmp.lt.u32.totalorder %s1470_s0, %s373_s18 }
  0x91   : > { %p1475_p3 = por %p1474_p11, %p1473_p5 }
  0x93   : > { %p1477_p6 = por %p1476_p8, %p1475_p3 }
  0x95   : > { %p1478_p13 = pnand %p1477_p6, %p1471_p4 }
  0x97   : > { %1481 = shalt.err (!%p1478_p13)  }
  0x98   : > { %s1482_s3 = scalar_lea.vmem %s2025_s26, 48  ;;  %s2074_s7 = scalar_lea.vmem %s2025_s26, 384 }
  0x99   : > { %p1483_p0 = scmp.ne.s32.totalorder %s2025_s26, %s1482_s3  ;;  %p1487_p1 = scmp.lt.s32.totalorder %s2025_s26, %s2025_s26 }
  0x9a   : > { %p1488_p7 = scmp.lt.s32.totalorder %s2074_s7, %s1482_s3 }
  0x9c   : > { %p1489_p9 = por %p1488_p7, %p1487_p1 }
  0x9e   : > { %p1490_p12 = pnand %p1489_p9, %p1483_p0 }
  0xa0   : > { %1493 = shalt.err (!%p1490_p12)  }
  0xa1   : > { %s2364_s8 = smov 128   ;;  %s2366_s9 = smov 1   ;;  %1240 = vmatpush1.bf16.msra.mxu0 %v1239_v47  ;;  %1267 = vmatpush3.bf16.msra.mxu1 %v1266_v48  ;;  %v1243_v56 = vpack.c.bf16 %v532_v51, %v529_v49  ;;  %v1269_v57 = vpack.c.bf16 %v534_v53, %v531_v52  ;;  %v535_v58 = vld [vmem:[#allocation7 + $0x120] sm:$0xff]  ;;  %v1245_v59 = vpack.c.bf16 %v539_v55, %v536_v54  ;;  %v538_v60 = vld [vmem:[#allocation7 + $0x138] sm:$0xff]  ;;  %v537_v61 = vld [vmem:[#allocation7 + $0x130] sm:$0xff] }
  0xa2   : > { %378 = dma.hbm_to_vmem [thread:$0]  %s373_s18, 48, %s2025_s26, [#allocation4], %s2364_s8, %s2364_s8, %s2366_s9  ;;  %1242 = vmatprep.subr.bf16.mxu0 %v1241_v50  ;;  %1268 = vmatprep.subr.bf16.mxu1 %v1775_v4  ;;  %v540_v62 = vld [vmem:[#allocation7 + $0x148] sm:$0xff]  ;;  %v542_v63 = vld [vmem:[#allocation7 + $0x158] sm:$0xff]  ;;  %v545_v0 = vld [vmem:[#allocation7 + $0x170] sm:$0xff]  ;;  %v1247_v1 = vpack.c.bf16 %v538_v60, %v535_v58 }
  0xa3   : > { %s386_s0 = smul.u32 24, %s384_s19  ;;  %p414_p4 = scmp.gt.s32.totalorder %s2038_s17, 0  ;;  %v1272_v2 = vpack.c.bf16 %v540_v62, %v537_v61  ;;  %v541_v3 = vld [vmem:[#allocation7 + $0x150] sm:$0xff]  ;;  %v1249_v5 = vpack.c.bf16 %v545_v0, %v542_v63  ;;  %v544_v6 = vld [vmem:[#allocation7 + $0x168] sm:$0xff]  ;;  %v543_v7 = vld [vmem:[#allocation7 + $0x160] sm:$0xff] }
  0xa4   : > { %s2092_s18 = scalar_select %p397_p10, %s2030_s15, 0  ;;  %v546_v8 = vld [vmem:[#allocation7 + $0x178] sm:$0xff] }
  0xa5   : > { %s387_s16 = sadd.s32 %s386_s0, %s385_s30  ;;  %1244 = vmatpush1.bf16.msra.mxu0 %v1243_v56  ;;  %1270 = vmatpush3.bf16.msra.mxu1 %v1269_v57 }
  0xa6   : > { %s1048_s11 = sshll.u32 %s387_s16, 4  ;;  %1246 = vmatprep.subr.bf16.mxu0 %v1245_v59  ;;  %1271 = vmatprep.subr.bf16.mxu1 %v1775_v4 }
  0xa7   : > { %s389_s28 = scalar_lea.hbm %s2345_s6, %s1048_s11 }
  0xa8   : > { %s1494_s30 = scalar_lea.hbm %s389_s28, 48  ;;  %p1497_p11 = scmp.lt.u32.totalorder %s389_s28, %s2345_s6 }
  0xa9   : > { %p1495_p10 = scmp.ne.s32.totalorder %s389_s28, %s1494_s30  ;;  %p1498_p3 = scmp.lt.u32.totalorder %s2065_s20, %s1494_s30 }
  0xaa   : > { %p1500_p6 = scmp.lt.u32.totalorder %s1494_s30, %s389_s28 }
  0xab   : > { %p1499_p8 = por %p1498_p3, %p1497_p11 }
  0xad   : > { %p1501_p13 = por %p1500_p6, %p1499_p8 }
  0xaf   : > { %p1502_p0 = pnand %p1501_p13, %p1495_p10 }
  0xb1   : > { %1505 = shalt.err (!%p1502_p0)  }
  0xb2   : > { %s1506_s0 = scalar_lea.vmem %s2032_s12, 48  ;;  %p1511_p7 = scmp.lt.s32.totalorder %s2032_s12, %s2025_s26 }
  0xb3   : > { %p1507_p1 = scmp.ne.s32.totalorder %s2032_s12, %s1506_s0  ;;  %p1512_p9 = scmp.lt.s32.totalorder %s2074_s7, %s1506_s0 }
  0xb5   : > { %p1513_p12 = por %p1512_p9, %p1511_p7 }
  0xb7   : > { %p1514_p5 = pnand %p1513_p12, %p1507_p1 }
  0xb9   : > { %1517 = shalt.err (!%p1514_p5)  }
  0xba   : > { %395 = dma.hbm_to_vmem [thread:$0]  %s389_s28, 48, %s2032_s12, [#allocation4], %s2364_s8, %s2364_s8, %s2366_s9  ;;  %1248 = vmatpush1.bf16.msra.mxu0 %v1247_v1  ;;  %1273 = vmatpush3.bf16.msra.mxu1 %v1272_v2  ;;  %v1251_v9 = vpack.c.bf16 %v544_v6, %v541_v3  ;;  %v1275_v10 = vpack.c.bf16 %v546_v8, %v543_v7 }
  0xbb   : > { %s2444_s18 = smov (!%p1050_p2, %s2092_s18), 383  ;;  %1250 = vmatprep.subr.bf16.mxu0 %v1249_v5  ;;  %1274 = vmatprep.subr.bf16.mxu1 %v1775_v4  ;;  %s1783_s30 = smov [#allocation2 + $0x3]  }
  0xbc   : > { %s415_s16 = scalar_select %p414_p4, %s2038_s17, 0 }
  0xbd   : > { %s401_s11 = sshrl.u32 %s2444_s18, 3  ;;  %s402_s19 = sand.u32 7, %s2444_s18  }
  0xbe   : > { %s403_s24 = smul.u32 24, %s401_s11  ;;  %s426_s22 = sshll.u32 %s1783_s30, 4  ;;  %1252 = vmatpush1.bf16.msra.mxu0 %v1251_v9  ;;  %1276 = vmatpush3.bf16.msra.mxu1 %v1275_v10  ;;  %s2126_s22 = int_to_ptr.vmem [resolvable:$true] %s426_s22 }
  0xbf   : > { %p2412_p5 = scmp.lt.s32.totalorder %s2038_s17, 383  ;;  %s2413_s2 = sld [smem:[#allocation41_spill]] }
  0xc0   : > { %s404_s12 = sadd.s32 %s403_s24, %s402_s19 }
  0xc1   : > { %s2446_s16 = smov (!%p2412_p5, %s415_s16), 383  ;;  %s1055_s18 = sshll.u32 %s404_s12, 4 }
  0xc2   : > { %s418_s3 = sshrl.u32 %s2446_s16, 3  ;;  %s406_s17 = scalar_lea.hbm %s2345_s6, %s1055_s18 }
  0xc3   : > { %s419_s30 = sand.u32 7, %s2446_s16   ;;  %s1518_s8 = scalar_lea.hbm %s406_s17, 48 }
  0xc4   : > { %p1519_p2 = scmp.ne.s32.totalorder %s406_s17, %s1518_s8  ;;  %p1521_p4 = scmp.lt.u32.totalorder %s406_s17, %s2345_s6 }
  0xc5   : > { %v2131_v11 = vld [vmem:[%s2413_s2] sm:$0xff]  ;;  %p1522_p10 = scmp.lt.u32.totalorder %s2065_s20, %s1518_s8  ;;  %p1524_p3 = scmp.lt.u32.totalorder %s1518_s8, %s406_s17 }
  0xc7   : > { %p1523_p11 = por %p1522_p10, %p1521_p4 }
  0xc9   : > { %p1525_p8 = por %p1524_p3, %p1523_p11 }
  0xcb   : > { %p1526_p6 = pnand %p1525_p8, %p1519_p2 }
  0xcd   : > { %1529 = shalt.err (!%p1526_p6)  }
  0xce   : > { %s1530_s24 = scalar_lea.vmem %s2086_s27, 48  ;;  %p1535_p0 = scmp.lt.s32.totalorder %s2086_s27, %s2025_s26 }
  0xcf   : > { %p1531_p13 = scmp.ne.s32.totalorder %s2086_s27, %s1530_s24  ;;  %p1536_p1 = scmp.lt.s32.totalorder %s2074_s7, %s1530_s24 }
  0xd1   : > { %p1537_p7 = por %p1536_p1, %p1535_p0 }
  0xd3   : > { %p1538_p9 = pnand %p1537_p7, %p1531_p13 }
  0xd5   : > { %1541 = shalt.err (!%p1538_p9)  }
  0xd6   : > { %s2414_s9 = smov 1   ;;  %s2415_s16 = smov 128   ;;  %629 = vmatmul.mubr.f32.vlgmr.msra.gmra.mrb[0].mxu0 %v2131_v11  ;;  %1184 = vmatmul.mubr.f32.vlgmr.msra.gmra.mrb[0].mxu1 %v2131_v11 }
  0xd7   : > { %412 = dma.hbm_to_vmem [thread:$0]  %s406_s17, 48, %s2086_s27, [#allocation4], %s2415_s16, %s2415_s16, %s2414_s9 }
  0xd8   : > { %s420_s8 = smul.u32 24, %s418_s3  ;;  %s2153_s12 = sld [smem:[#allocation6 + $0x4]] }
  0xd9   : > { %s2155_s15 = sld [smem:[#allocation6 + $0x5]]  ;;  %s1784_s18 = smov [#allocation2 + $0x4]  }
  0xda   : > { %s421_s28 = sadd.s32 %s420_s8, %s419_s30  ;;  %s443_s0 = sshll.u32 %s1784_s18, 4  ;;  %s2157_s0 = int_to_ptr.vmem [resolvable:$true] %s443_s0 }
  0xdb   : > { %s1062_s11 = sshll.u32 %s421_s28, 4 }
  0xdc   : > { %s423_s2 = scalar_lea.hbm %s2345_s6, %s1062_s11 }
  0xdd   : > { %s1542_s27 = scalar_lea.hbm %s423_s2, 48  ;;  %p1545_p5 = scmp.lt.u32.totalorder %s423_s2, %s2345_s6 }
  0xde   : > { %p1543_p12 = scmp.ne.s32.totalorder %s423_s2, %s1542_s27  ;;  %p1546_p2 = scmp.lt.u32.totalorder %s2065_s20, %s1542_s27 }
  0xdf   : > { %p1548_p10 = scmp.lt.u32.totalorder %s1542_s27, %s423_s2 }
  0xe0   : > { %p1547_p4 = por %p1546_p2, %p1545_p5 }
  0xe2   : > { %p1549_p11 = por %p1548_p10, %p1547_p4 }
  0xe4   : > { %p1550_p3 = pnand %p1549_p11, %p1543_p12 }
  0xe6   : > { %1553 = shalt.err (!%p1550_p3)  }
  0xe7   : > { %s1554_s3 = scalar_lea.vmem %s2126_s22, 48  ;;  %p1559_p6 = scmp.lt.s32.totalorder %s2126_s22, %s2025_s26 }
  0xe8   : > { %p1555_p8 = scmp.ne.s32.totalorder %s2126_s22, %s1554_s3  ;;  %p1560_p13 = scmp.lt.s32.totalorder %s2074_s7, %s1554_s3 }
  0xea   : > { %p1561_p0 = por %p1560_p13, %p1559_p6 }
  0xec   : > { %p1562_p1 = pnand %p1561_p0, %p1555_p8 }
  0xee   : > { %1565 = shalt.err (!%p1562_p1)  }
  0xef   : > { %429 = dma.hbm_to_vmem [thread:$0]  %s423_s2, 48, %s2126_s22, [#allocation4], %s2415_s16, %s2415_s16, %s2414_s9 }
  0xf0   : > { %p431_p7 = scmp.gt.s32.totalorder %s2153_s12, 0  ;;  %p1064_p9 = scmp.lt.s32.totalorder %s2153_s12, 383 }
  0xf1   : > { %p448_p12 = scmp.gt.s32.totalorder %s2155_s15, 0  ;;  %p1071_p5 = scmp.lt.s32.totalorder %s2155_s15, 383 }
  0xf2   : > { %s2448_s12 = smov (!%p431_p7, %s2153_s12), 0  ;;  %s1785_s24 = smov [#allocation2 + $0x5]  }
  0xf3   : > { %s2450_s15 = smov (!%p448_p12, %s2155_s15), 0  ;;  %s2452_s12 = smov (!%p1064_p9, %s2448_s12), 383 }
  0xf4   : > { %s2454_s15 = smov (!%p1071_p5, %s2450_s15), 383  ;;  %s435_s29 = sshrl.u32 %s2452_s12, 3 }
  0xf5   : > { %s436_s30 = sand.u32 7, %s2452_s12   ;;  %s437_s8 = smul.u32 24, %s435_s29 }
  0xf6   : > { %s452_s28 = sshrl.u32 %s2454_s15, 3  ;;  %s453_s18 = sand.u32 7, %s2454_s15  }
  0xf7   : > { %s454_s11 = smul.u32 24, %s452_s28  ;;  %s438_s19 = sadd.s32 %s437_s8, %s436_s30 }
  0xf8   : > { %s460_s27 = sshll.u32 %s1785_s24, 4  ;;  %s1069_s17 = sshll.u32 %s438_s19, 4  ;;  %s461_s27 = int_to_ptr.vmem [resolvable:$true] %s460_s27 }
  0xf9   : > { %s455_s2 = sadd.s32 %s454_s11, %s453_s18  ;;  %s440_s25 = scalar_lea.hbm %s2345_s6, %s1069_s17 }
  0xfa   : > { %s1076_s13 = sshll.u32 %s455_s2, 4  ;;  %s1566_s14 = scalar_lea.hbm %s440_s25, 48 }
  0xfb   : > { %p1567_p2 = scmp.ne.s32.totalorder %s440_s25, %s1566_s14  ;;  %p1569_p4 = scmp.lt.u32.totalorder %s440_s25, %s2345_s6 }
  0xfc   : > { %p1570_p10 = scmp.lt.u32.totalorder %s2065_s20, %s1566_s14  ;;  %p1572_p3 = scmp.lt.u32.totalorder %s1566_s14, %s440_s25 }
  0xfe   : > { %p1571_p11 = por %p1570_p10, %p1569_p4 }
 0x100   : > { %p1573_p8 = por %p1572_p3, %p1571_p11 }
 0x102   : > { %p1574_p6 = pnand %p1573_p8, %p1567_p2 }
 0x104   : > { %1577 = shalt.err (!%p1574_p6)  }
 0x105   : > { %s1578_s12 = scalar_lea.vmem %s2157_s0, 48  ;;  %p1583_p0 = scmp.lt.s32.totalorder %s2157_s0, %s2025_s26 }
 0x106   : > { %p1579_p13 = scmp.ne.s32.totalorder %s2157_s0, %s1578_s12  ;;  %p1584_p1 = scmp.lt.s32.totalorder %s2074_s7, %s1578_s12 }
 0x108   : > { %p1585_p7 = por %p1584_p1, %p1583_p0 }
 0x10a   : > { %p1586_p9 = pnand %p1585_p7, %p1579_p13 }
 0x10c   : > { %1589 = shalt.err (!%p1586_p9)  }
 0x10d   : > { %446 = dma.hbm_to_vmem [thread:$0]  %s440_s25, 48, %s2157_s0, [#allocation4], %s2415_s16, %s2415_s16, %s2414_s9 }
 0x10e   : > { %s457_s14 = scalar_lea.hbm %s2345_s6, %s1076_s13 }
 0x10f   : > { %s1590_s15 = scalar_lea.hbm %s457_s14, 48  ;;  %p1593_p5 = scmp.lt.u32.totalorder %s457_s14, %s2345_s6 }
 0x110   : > { %p1591_p12 = scmp.ne.s32.totalorder %s457_s14, %s1590_s15  ;;  %p1594_p2 = scmp.lt.u32.totalorder %s2065_s20, %s1590_s15 }
 0x111   : > { %p1596_p10 = scmp.lt.u32.totalorder %s1590_s15, %s457_s14 }
 0x112   : > { %p1595_p4 = por %p1594_p2, %p1593_p5 }
 0x114   : > { %p1597_p11 = por %p1596_p10, %p1595_p4 }
 0x116   : > { %p1598_p3 = pnand %p1597_p11, %p1591_p12 }
 0x118   : > { %1601 = shalt.err (!%p1598_p3)  }
 0x119   : > { %s1602_s8 = scalar_lea.vmem %s461_s27, 48  ;;  %p1607_p6 = scmp.lt.s32.totalorder %s461_s27, %s2025_s26 }
 0x11a   : > { %p1603_p8 = scmp.ne.s32.totalorder %s461_s27, %s1602_s8  ;;  %p1608_p13 = scmp.lt.s32.totalorder %s2074_s7, %s1602_s8 }
 0x11c   : > { %p1609_p0 = por %p1608_p13, %p1607_p6 }
 0x11e   : > { %p1610_p1 = pnand %p1609_p0, %p1603_p8 }
 0x120   : > { %1613 = shalt.err (!%p1610_p1)  }
 0x121   : > { %463 = dma.hbm_to_vmem [thread:$0]  %s457_s14, 48, %s461_s27, [#allocation4], %s2415_s16, %s2415_s16, %s2414_s9 }
 0x122   : > { %s1077_s25 = sld [smem:[#allocation6 + $0x6]]  ;;  %s1084_s13 = sld [smem:[#allocation6 + $0x7]] }
 0x123   : > { %s1786_s27 = smov [#allocation2 + $0x6]  }
 0x124   : > { %s477_s17 = sshll.u32 %s1786_s27, 4  ;;  %s478_s17 = int_to_ptr.vmem [resolvable:$true] %s477_s17 }
 0x128   : > { %p465_p7 = scmp.gt.s32.totalorder %s1077_s25, 0  ;;  %p482_p9 = scmp.gt.s32.totalorder %s1084_s13, 0 }
 0x129   : > { %p1078_p12 = scmp.lt.s32.totalorder %s1077_s25, 383  ;;  %p1085_p5 = scmp.lt.s32.totalorder %s1084_s13, 383 }
 0x12a   : > { %s466_s0 = scalar_select %p465_p7, %s1077_s25, 0 }
 0x12b   : > { %s2456_s13 = smov (!%p482_p9, %s1084_s13), 0 }
 0x12c   : > { %s2458_s0 = smov (!%p1078_p12, %s466_s0), 383  ;;  %s2460_s13 = smov (!%p1085_p5, %s2456_s13), 383 }
 0x12d   : > { %s469_s28 = sshrl.u32 %s2458_s0, 3  ;;  %s470_s18 = sand.u32 7, %s2458_s0  }
 0x12e   : > { %s471_s11 = smul.u32 24, %s469_s28  ;;  %s486_s19 = sshrl.u32 %s2460_s13, 3 }
 0x12f   : > { %s487_s10 = sand.u32 7, %s2460_s13  }
 0x130   : > { %s472_s24 = sadd.s32 %s471_s11, %s470_s18 }
 0x131   : > { %s1083_s2 = sshll.u32 %s472_s24, 4 }
 0x132   : > { %s474_s12 = scalar_lea.hbm %s2345_s6, %s1083_s2 }
 0x133   : > { %s1614_s21 = scalar_lea.hbm %s474_s12, 48  ;;  %p1617_p4 = scmp.lt.u32.totalorder %s474_s12, %s2345_s6 }
 0x134   : > { %p1615_p2 = scmp.ne.s32.totalorder %s474_s12, %s1614_s21  ;;  %p1618_p10 = scmp.lt.u32.totalorder %s2065_s20, %s1614_s21 }
 0x135   : > { %p1620_p3 = scmp.lt.u32.totalorder %s1614_s21, %s474_s12 }
 0x136   : > { %p1619_p11 = por %p1618_p10, %p1617_p4 }
 0x138   : > { %p1621_p8 = por %p1620_p3, %p1619_p11 }
 0x13a   : > { %p1622_p6 = pnand %p1621_p8, %p1615_p2 }
 0x13c   : > { %1625 = shalt.err (!%p1622_p6)  }
 0x13d   : > { %s1626_s29 = scalar_lea.vmem %s478_s17, 48  ;;  %p1631_p0 = scmp.lt.s32.totalorder %s478_s17, %s2025_s26 }
 0x13e   : > { %p1627_p13 = scmp.ne.s32.totalorder %s478_s17, %s1626_s29  ;;  %p1632_p1 = scmp.lt.s32.totalorder %s2074_s7, %s1626_s29 }
 0x140   : > { %p1633_p7 = por %p1632_p1, %p1631_p0 }
 0x142   : > { %p1634_p9 = pnand %p1633_p7, %p1627_p13 }
 0x144   : > { %1637 = shalt.err (!%p1634_p9)  }
 0x145   : > { %480 = dma.hbm_to_vmem [thread:$0]  %s474_s12, 48, %s478_s17, [#allocation4], %s2415_s16, %s2415_s16, %s2414_s9 }
 0x146   : > { %s488_s30 = smul.u32 24, %s486_s19  ;;  %s1787_s8 = smov [#allocation2 + $0x7]  }
 0x147   : > { %s494_s25 = sshll.u32 %s1787_s8, 4  ;;  %s495_s25 = int_to_ptr.vmem [resolvable:$true] %s494_s25 }
 0x148   : > { %s489_s13 = sadd.s32 %s488_s30, %s487_s10 }
 0x149   : > { %s1090_s0 = sshll.u32 %s489_s13, 4 }
 0x14a   : > { %s491_s11 = scalar_lea.hbm %s2345_s6, %s1090_s0 }
 0x14b   : > { %s1638_s24 = scalar_lea.hbm %s491_s11, 48  ;;  %p1641_p5 = scmp.lt.u32.totalorder %s491_s11, %s2345_s6 }
 0x14c   : > { %p1639_p12 = scmp.ne.s32.totalorder %s491_s11, %s1638_s24  ;;  %p1642_p2 = scmp.lt.u32.totalorder %s2065_s20, %s1638_s24 }
 0x14d   : > { %p1644_p10 = scmp.lt.u32.totalorder %s1638_s24, %s491_s11 }
 0x14e   : > { %p1643_p4 = por %p1642_p2, %p1641_p5 }
 0x150   : > { %p1645_p11 = por %p1644_p10, %p1643_p4 }
 0x152   : > { %p1646_p3 = pnand %p1645_p11, %p1639_p12 }
 0x154   : > { %1649 = shalt.err (!%p1646_p3)  }
 0x155   : > { %s1650_s19 = scalar_lea.vmem %s495_s25, 48  ;;  %p1655_p6 = scmp.lt.s32.totalorder %s495_s25, %s2025_s26 }
 0x156   : > { %p1651_p8 = scmp.ne.s32.totalorder %s495_s25, %s1650_s19  ;;  %p1656_p13 = scmp.lt.s32.totalorder %s2074_s7, %s1650_s19 }
 0x158   : > { %p1657_p0 = por %p1656_p13, %p1655_p6 }
 0x15a   : > { %p1658_p1 = pnand %p1657_p0, %p1651_p8 }
 0x15c   : > { %1661 = shalt.err (!%p1658_p1)  }
 0x15d   : > { %497 = dma.hbm_to_vmem [thread:$0]  %s491_s11, 48, %s495_s25, [#allocation4], %s2415_s16, %s2415_s16, %s2414_s9  ;;  %v549_v4 = vlaneseq }
 0x15e   : > { %v547_v15 = vld [vmem:[%s2344_s5] sm:$0x7] }
 0x15f   : > { %v550_v12 = vshrl.u32 %v549_v4, 7 }
 0x161   : > { %v551_v13 = vsub.s32 0, %v550_v12  ;;  %v559_v14 = vsub.s32 2, %v550_v12  ;;  %v555_v16 = vsub.s32 1, %v550_v12 }
 0x163   : > { %v552_v17 = vrot.slane %v547_v15, %v551_v13  ;;  %v560_v18 = vrot.slane %v547_v15, %v559_v14  ;;  %v556_v19 = vrot.slane %v547_v15, %v555_v16 }
 0x1a9   : > { %v630_v20 = vpop.f32.mrb[0].mxu0  ;;  %v701_v21 = vpop.f32.mrb[0].mxu1 }
 0x1aa   : > { %v631_v22 = vadd.f32 %v630_v20, %v552_v17  ;;  %v702_v23 = vadd.f32 %v701_v21, %v560_v18  ;;  %v632_v24 = vpop.f32.mrb[1].mxu0  ;;  %v1185_v25 = vpop.f32.mrb[1].mxu1 }
 0x1ab   : > { %v633_v26 = vadd.f32 %v632_v24, %v556_v19 }
 0x1ac   : > { %1742 = dma.done.wait [#allocation4], 384 }
 0x1ad   : > { %1743 = vsyncadd [#allocation4], 4294966912  ;;  %v1788_v27 = vmov 0   ;;  %v712_v28 = vld [vmem:[%s2340_s1] sm:$0xff]  ;;  %v710_v31 = vld [vmem:[#allocation2 + $0x8] sm:$0xff] }
 0x1ae   : > { %1387 = vset.pattern.permute.xlu0 %v1788_v27  ;;  %v721_v29 = vld [vmem:[%s2343_s4] sm:$0x7]  ;;  %v711_v46 = vld [vmem:[#allocation2 + $0x10] sm:$0xff] }
 0x1af   : > { %715 = vperm.xlu0 %1387, %v712_v28   ;;  %v709_v30 = vld [vmem:[#allocation2] sm:$0xff]  ;;  %v726_v32 = vrot.slane %v721_v29, %v551_v13  ;;  %v730_v33 = vrot.slane %v721_v29, %v555_v16  ;;  %v734_v47 = vrot.slane %v721_v29, %v559_v14 }
 0x22e   : > { %v716_v34 = vpop.permute.xlu0 %715 }
 0x22f   : > { %v718_v35 = vmul.f32 %v716_v34, %v709_v30  ;;  %v719_v36 = vmul.f32 %v716_v34, %v710_v31  ;;  %v720_v48 = vmul.f32 %v716_v34, %v711_v46 }
 0x231   : > { %v738_v37 = vadd.f32 %v726_v32, %v718_v35  ;;  %v739_v38 = vadd.f32 %v730_v33, %v719_v36  ;;  %v740_v51 = vadd.f32 %v734_v47, %v720_v48 }
 0x233   : > { %v741_v39 = vadd.f32 %v738_v37, %v631_v22  ;;  %v748_v41 = vadd.f32 %v739_v38, %v633_v26 }
 0x235   : > { %v1091_v40 = vmul.f32 -1.442695, %v741_v39  ;;  %v1092_v42 = vmul.f32 -1.442695, %v748_v41 }
 0x237   : > { %1388 = vpow2.f32 %v1091_v40 }
 0x238   : > { %1390 = vpow2.f32 %v1092_v42 }
 0x241   : > { %v1389_v43 = vpop.eup %1388 }
 0x242   : > { %v745_v44 = vadd.f32 1.0, %v1389_v43  ;;  %v1391_v45 = vpop.eup %1390 }
 0x243   : > { %v752_v49 = vadd.f32 1.0, %v1391_v45 }
 0x244   : > { %1392 = vrcp.f32 %v745_v44 }
 0x245   : > { %1394 = vrcp.f32 %v752_v49 }
 0x24e   : > { %v1393_v50 = vpop.eup %1392 }
 0x24f   : > { %v755_v52 = vmul.f32 %v1393_v50, %v702_v23  ;;  %v1395_v54 = vpop.eup %1394 }
 0x250   : > { %v758_v55 = vsub.f32 1.0, %v1395_v54  ;;  %v760_v58 = vmul.f32 %v1395_v54, %v2131_v11 }
 0x251   : > { %v756_v53 = vadd.f32 %v755_v52, %v740_v51 }
 0x253   : > { %1396 = vtanh.f32 %v756_v53 }
 0x25d   : > { %v1397_v56 = vpop.eup %1396 }
 0x25e   : > { %v759_v57 = vmul.f32 %v1397_v56, %v758_v55 }
 0x260   : > { %v761_v59 = vadd.f32 %v760_v58, %v759_v57 }
 0x262   : > { %762 = vst [vmem:[#allocation13] sm:$0xff] %v761_v59  ;;  %763 = vst [vmem:[#allocation3] sm:$0xff] %v761_v59 }
 0x263 PF: > { %v765_v60 = vld [vmem:[%s2003_s23] sm:$0xff]  ;;  %v766_v61 = vld [vmem:[%s2003_s23 + $0x8] sm:$0xff]  ;;  %v767_v62 = vld [vmem:[%s2003_s23 + $0x10] sm:$0xff]  ;;  %v1789_v63 = vmov 0.0|0.0   ;;  %vm1790_vm1 = vmmov 0   ;;  %v1791_v2 = vmov 0.0  }
 0x264   : > { %1277 = vmatprep.subr.bf16.mxu0 %v1789_v63  ;;  %v1278_v0 = vpack.c.bf16 %v766_v61, %v765_v60  ;;  %v768_v1 = vld [vmem:[%s2003_s23 + $0x18] sm:$0xff]  ;;  %1218 = vmatprep.mubr.msk.f32.mxu0 %vm1790_vm1, %v1791_v2  ;;  %v769_v5 = vld [vmem:[%s2003_s23 + $0x20] sm:$0xff]  ;;  %v770_v6 = vld [vmem:[%s2003_s23 + $0x28] sm:$0xff]  ;;  %s2416_s22 = sld [smem:[#allocation33_spill]]  ;;  %s1792_s3 = smov [#allocation13]  }
 0x265   : > { %v1281_v3 = vpack.c.bf16 %v768_v1, %v767_v62  ;;  %v1284_v7 = vpack.c.bf16 %v770_v6, %v769_v5  ;;  %v771_v8 = vld [vmem:[%s2003_s23 + $0x30] sm:$0xff]  ;;  %v772_v9 = vld [vmem:[%s2003_s23 + $0x38] sm:$0xff]  ;;  %v773_v11 = vld [vmem:[%s2003_s23 + $0x40] sm:$0xff]  ;;  %s885_s12 = sshll.u32 %s1792_s3, 4  ;;  %s886_s12 = int_to_ptr.vmem [resolvable:$true] %s885_s12 }
 0x266   : > { %1279 = vmatpush3.bf16.msra.mxu0 %v1278_v0  ;;  %v1287_v10 = vpack.c.bf16 %v772_v9, %v771_v8  ;;  %v774_v4 = vld [vmem:[%s2003_s23 + $0x48] sm:$0xff]  ;;  %v775_v13 = vld [vmem:[%s2003_s23 + $0x50] sm:$0xff]  ;;  %v776_v14 = vld [vmem:[%s2003_s23 + $0x58] sm:$0xff]  ;;  %s1662_s10 = scalar_lea.vmem %s886_s12, 128  ;;  %p1669_p2 = scmp.lt.s32.totalorder %s886_s12, %s886_s12 }
 0x267   : > { %1280 = vmatprep.subr.bf16.mxu0 %v1789_v63  ;;  %v1290_v12 = vpack.c.bf16 %v774_v4, %v773_v11  ;;  %v1293_v15 = vpack.c.bf16 %v776_v14, %v775_v13  ;;  %v777_v16 = vld [vmem:[%s2003_s23 + $0x60] sm:$0xff]  ;;  %v778_v17 = vld [vmem:[%s2003_s23 + $0x68] sm:$0xff]  ;;  %v779_v19 = vld [vmem:[%s2003_s23 + $0x70] sm:$0xff]  ;;  %p1663_p7 = scmp.ne.s32.totalorder %s886_s12, %s1662_s10  ;;  %p1670_p4 = scmp.lt.s32.totalorder %s1662_s10, %s1662_s10 }
 0x268   : > { %v1296_v18 = vpack.c.bf16 %v778_v17, %v777_v16  ;;  %v780_v20 = vld [vmem:[%s2003_s23 + $0x78] sm:$0xff] }
 0x269   : > { %v1299_v21 = vpack.c.bf16 %v780_v20, %v779_v19  ;;  %v764_v22 = vld [vmem:[#allocation3] sm:$0xff]  ;;  %p1671_p10 = por %p1670_p4, %p1669_p2 }
 0x26a   : > { %1282 = vmatpush3.bf16.msra.mxu0 %v1281_v3  ;;  %p2417_p9 = scmp.eq.s32.totalorder %s2416_s22, 2 }
 0x26b   : > { %1283 = vmatprep.subr.bf16.mxu0 %v1789_v63 }
 0x26c   : > { %p1664_p12 = pnand %p1663_p7, %p2417_p9 }
 0x26e   : > { %1285 = vmatpush3.bf16.msra.mxu0 %v1284_v7  ;;  %p1665_p5 = pneg %p1664_p12 }
 0x26f   : > { %1286 = vmatprep.subr.bf16.mxu0 %v1789_v63 }
 0x270   : > { %p1672_p11 = pnand %p1671_p10, %p1665_p5 }
 0x272   : > { %1288 = vmatpush3.bf16.msra.mxu0 %v1287_v10 }
 0x273   : > { %1289 = vmatprep.subr.bf16.mxu0 %v1789_v63 }
 0x276   : > { %1291 = vmatpush3.bf16.msra.mxu0 %v1290_v12 }
 0x277   : > { %1292 = vmatprep.subr.bf16.mxu0 %v1789_v63 }
 0x27a   : > { %1294 = vmatpush3.bf16.msra.mxu0 %v1293_v15 }
 0x27b   : > { %1295 = vmatprep.subr.bf16.mxu0 %v1789_v63 }
 0x27e   : > { %1297 = vmatpush3.bf16.msra.mxu0 %v1296_v18 }
 0x27f   : > { %1298 = vmatprep.subr.bf16.mxu0 %v1789_v63 }
 0x282   : > { %1300 = vmatpush3.bf16.msra.mxu0 %v1299_v21 }
 0x285   : > { %1219 = vmatmul.mubr.f32.vlgmr.msra.gmra.mrb[0].mxu0 %v764_v22 }
 0x286   : > { %1675 = shalt.err (!%p1672_p11)
}
 0x287   : > { %s2418_s14 = sld [smem:[#allocation46_spill]]  ;;  %p2419_p8 = pmov %p2417_p9 }
 0x28d   : > { %s1676_s15 = scalar_lea.hbm %s2418_s14, 128 }
 0x28e   : > { %p1677_p3 = scmp.ne.s32.totalorder %s2418_s14, %s1676_s15  ;;  %p1682_p0 = scmp.lt.u32.totalorder %s1676_s15, %s2418_s14 }
 0x290   : > { %p1678_p6 = pnand %p1677_p3, %p2419_p8 }
 0x292   : > { %p1679_p13 = pneg %p1678_p6 }
 0x294   : > { %p1684_p1 = pnand %p1682_p0, %p1679_p13 }
 0x296   : > { %1687 = shalt.err (!%p1684_p1)
}
 0x297   : > { %p2420_p7 = pmov %p2419_p8  ;;  %s2421_s28 = sld [smem:[#allocation39_spill]] }
 0x298   : > { %s2422_s18 = sld [smem:[#allocation40_spill]]  ;;  %s2423_s11 = sld [smem:[#allocation38_spill]] }
 0x299   : > { %s2424_s24 = sld [smem:[#allocation36_spill]]  ;;  %s2425_s19 = sld [smem:[#allocation44_spill]] }
 0x29a   : > { %1309 = dma.vmem_to_hbm [thread:$0]  (%p2420_p7), %s886_s12, 128, %s2418_s14, [#allocation14]  }
 0x29b   : > { %s1095_s17 = sshll.u32 %s2416_s22, 7  ;;  %s2427_s16 = sld [smem:[#allocation45_spill]] }
 0x29c   : > { %s1793_s23 = smov [#allocation12]  }
 0x29d   : > { %s1692_s21 = sshll.u32 %s1793_s23, 4  ;;  %s1693_s21 = int_to_ptr.vmem [resolvable:$false] %s1692_s21 }
 0x29e   : > { %s874_s26 = sshll.u32 %s2422_s18, 4  ;;  %s861_s12 = scalar_lea.sflag [#allocation9], %s2423_s11  ;;  %s2293_s26 = int_to_ptr.vmem [resolvable:$true] %s874_s26 }
 0x29f   : > { %s2426_s20 = scalar_lea.vmem %s2425_s19, %s2421_s28  ;;  %s1688_s10 = scalar_lea.vmem %s2293_s26, 128 }
 0x2a0   : > { %v1093_v23 = vld [vmem:[%s2426_s20] ss:$0 sm:$0xff]  ;;  %p1689_p9 = scmp.ne.s32.totalorder %s2293_s26, %s1688_s10  ;;  %p2428_p12 = scmp.ne.s32.totalorder %s2424_s24, 0 }
 0x2a1   : > { %s2291_s3 = scalar_lea.hbm %s2427_s16, %s1095_s17  ;;  %s1694_s15 = scalar_lea.vmem %s1693_s21, 256 }
 0x2a2   : > { %p1690_p5 = pnand %p1689_p9, %p2428_p12  ;;  %p1695_p4 = scmp.lt.s32.totalorder %s2293_s26, %s1693_s21 }
 0x2a3   : > { %p1696_p10 = scmp.lt.s32.totalorder %s1694_s15, %s1688_s10 }
 0x2a4   : > { %p1691_p2 = pneg %p1690_p5 }
 0x2a5   : > { %p1697_p11 = por %p1696_p10, %p1695_p4 }
 0x2a7   : > { %p1698_p3 = pnand %p1697_p11, %p1691_p2 }
 0x358   : > { %v854_v24 = vpop.f32.mrb[0].mxu0 }
 0x359   : > { %v855_v25 = vadd.f32 %v1093_v23, %v854_v24  ;;  %v1220_v26 = vpop.f32.mrb[1].mxu0 }
 0x35b   : > { %1398 = vtanh.f32 %v855_v25 }
 0x365   : > { %v1399_v27 = vpop.eup %1398 }
 0x366   : > { %859 = vst [vmem:[%s2422_s18] sm:$0xff] %v1399_v27 }
 0x367   : > { %1701 = shalt.err (!%p1698_p3)
}
 0x368   : > { %s1702_s29 = scalar_lea.hbm %s2291_s3, 128  ;;  %s1706_s25 = scalar_lea.hbm %s2427_s16, 384 }
 0x369   : > { %p1703_p8 = scmp.ne.s32.totalorder %s2291_s3, %s1702_s29  ;;  %p1707_p0 = scmp.lt.u32.totalorder %s2291_s3, %s2427_s16 }
 0x36a   : > { %p1708_p1 = scmp.lt.u32.totalorder %s1706_s25, %s1702_s29  ;;  %p1710_p9 = scmp.lt.u32.totalorder %s1702_s29, %s2291_s3 }
 0x36b   : > { %p1704_p6 = pnand %p1703_p8, %p2428_p12 }
 0x36c   : > { %p1709_p7 = por %p1708_p1, %p1707_p0 }
 0x36d   : > { %p1705_p13 = pneg %p1704_p6 }
 0x36e   : > { %p1711_p5 = por %p1710_p9, %p1709_p7 }
 0x370   : > { %p1712_p2 = pnand %p1711_p5, %p1705_p13 }
 0x372   : > { %1715 = shalt.err (!%p1712_p2)
}
 0x373   : > { %1307 = dma.vmem_to_hbm [thread:$0]  (%p2428_p12), %s2293_s26, 128, %s2291_s3, %s861_s12  }
 0x374   : > { %p2429_p4 = scmp.eq.s32.totalorder %s2416_s22, 2 }
 0x376   : > { %1745 = dma.done.wait (%p2429_p4), [#allocation14], 128   ;;  %p2430_p10 = pmov %p2429_p4 }
 0x378   : > { %1747 = vsyncadd (%p2430_p10), [#allocation14], 4294967168 }
 0x379 PF: > { %s2431_s28 = sld [smem:[#allocation32_spill]]  ;;  %s2432_s18 = sld [smem:[#allocation29_spill]] }
 0x37a   : > { %s2433_s11 = sld [smem:[#allocation37_spill]] }
 0x37f   : > { %p1330_p11 = scmp.ge.s32.totalorder %s2431_s28, 2  ;;  %s901_s27 = sand.u32 1, %s2432_s18  }
 0x380   : > { %p2434_p3 = scmp.ne.s32.totalorder %s2433_s11, 0  ;;  %s902_s2 = scalar_lea.sflag [#allocation9], %s901_s27 }
 0x382   : > { %p1322_p8 = pnand %p1330_p11, %p2434_p3 }
 0x384   : > { %1749 = dma.done.wait (!%p1322_p8), %s902_s2, 128  }
 0x385   : > { %1751 = vsyncadd (!%p1322_p8), %s902_s2, 4294967168  ;;  %s2435_s20 = sld [smem:[#allocation34_spill]]  ;;  %s2436_s0 = sld [smem:[#allocation30_spill]] }
 0x386   : > { %s2437_s18 = sld [smem:[#allocation31_spill]]  ;;  %s2438_s19 = sld [smem:[#allocation35_spill]] }
 0x38b   : > { %p32_p12 = scmp.ge.s32.totalorder %s2435_s20, 5  }
 0x38d   :  { %34 = sbr.rel (!%p32_p12) target bundleno = 24 (0x18), region = 128 }
 0x394   :  { %907 = vsyncpa [#allocation8], 1 }
 0x395   :  { %909 = vsyncpa [#allocation8 + $0x1], 1 }
 0x396   :  { %910 = vsyncpa [#allocation11], 1 }
 0x397   :  { %912 = vsyncpa [#allocation11 + $0x1], 1 }
 0x398   :  { %913 = vsyncpa [#allocation9], 1 }
 0x399   :  { %915 = vsyncpa [#allocation9 + $0x1], 1 }
 0x39a   :  { %916 = vsyncpa [#allocation14], 1 }
 0x39b   :  { %917 = vsyncmov [#allocation4] }
 0x39e   :  { %s918_s22 = vpop.sfrf %917 }
 0x39f   :  { %p1100_p6 = scmp.ne.s32.totalorder %s918_s22, 0 }
 0x3a1   :  { %922 = shalt.err (%p1100_p6)  }

</bundles_post_ra>
